<compile_context>
chip_gen: v7x
topology: tpu7x:2x2x1
jax: 0.10.0
libtpu: 0.0.40
codegen_flags: <defaults>
</compile_context>

<pallas_src>
import functools

import jax
import jax.numpy as jnp
from jax.experimental import pallas as pl
from jax.experimental.pallas import tpu as pltpu

# (in_channels, out_channels) for conv1..conv6 (all kernel_size=1)
CONV_DIMS = [(3, 6), (6, 12), (12, 18), (18, 18), (18, 18), (18, 18)]
N_CONV = len(CONV_DIMS)
C_IN = 3
C_OUT = CONV_DIMS[-1][1]            # 18
H, W = 5, 5                         # 25 * 18 = fc1 in_features -> 5x5 spatial
P = H * W                           # 25 pixels
FC1_IN, FC1_OUT = P * C_OUT, 100    # 450, 100
FC2_OUT = 10

LANE = 128                          # TPU lane width (conv/fc matmul N dimension)
K_PAD = 32                          # padded channel block actually contracted (K)
ONES_IN = K_PAD - 1                 # constant-1 lane inside the 32-lane channel block
ONES_FC = FC1_OUT                   # constant-1 lane of the fc1 output (for fc2 bias)


# ----------------------------------------------------------------------------- kernel
def cnn_fused_kernel(x_ref, wc_ref, w1_ref, w2_ref, out_ref, *, npad):
    """Fused forward pass, everything resident in VMEM/vregs.

    x_ref : (P*npad, 32)   pixel-major activations; row p*npad+n = pixel p, batch n.
                           lanes 0..2 = input channels, lane 31 = 1.0 (bias lane).
    wc_ref: (6, 32, 128)   bf16 conv weights; bias folded into row 31, [31,31]=1.
    w1_ref: (P, 32, 128)   bf16 fc1 weights split per pixel (torch channel-major
                           flatten folded offline); fc1 bias in block 0 row 31,
                           [0,31,100]=1 keeps a ones lane alive for the fc2 bias.
    w2_ref: (128, 128)     bf16 fc2 weights; bias folded into row 100.
    out   : (npad, 128)    f32; rows < N, lanes < 10 hold the real logits.
    """
    f32, bf16 = jnp.float32, jnp.bfloat16

    h = x_ref[...]                                                  # (P*npad, 32) f32
    # conv1..conv6 (1x1 conv == per-pixel matmul) + ReLU.  Only the first 32 lanes
    # are contracted (18 channels + ones lane); bf16 operands -> single MXU pass,
    # f32 accumulation.  Zero-padded lanes stay exactly zero through ReLU.
    for i in range(N_CONV):
        lhs = h[:, :K_PAD].astype(bf16)                             # (P*npad, 32) bf16
        h = jnp.maximum(
            jnp.dot(lhs, wc_ref[i], preferred_element_type=f32), 0.0)   # (P*npad, 128)

    # fc1: PyTorch's channel-major flatten is pre-baked into the per-pixel weight
    # blocks, so fc1 is a single batched contraction over the pixel axis followed
    # by one sum -- no 24-deep serial += chain, no in-kernel transpose/reshape
    # across tile boundaries (npad == 8 == f32 sublane tile).
    h3 = h.reshape(P, npad, LANE)[:, :, :K_PAD].astype(bf16)        # (P, npad, 32)
    parts = jax.lax.dot_general(
        h3, w1_ref[...],
        dimension_numbers=(((2,), (1,)), ((0,), (0,))),             # batch over pixels
        preferred_element_type=f32)                                 # (P, npad, 128)
    h1 = jnp.maximum(jnp.sum(parts, axis=0), 0.0)                   # relu(fc1), lane 100 == 1

    # fc2 (bias folded via the ones lane of h1); lane-dense (npad, 128) store.
    out_ref[...] = jnp.dot(h1.astype(bf16), w2_ref[...],
                           preferred_element_type=f32)


# ----------------------------------------------------------------------------- wrapper
@jax.jit
def cnn_forward(x_nchw, wc, w1, w2):
    n, c, hh, ww = x_nchw.shape
    p = hh * ww
    assert p == P and c == C_IN
    npad = max(8, ((n + 7) // 8) * 8)

    # NCHW -> (P, N, C) pixel-major; pad channels to 32 lanes with the bias ("ones")
    # lane at 31 set for EVERY row (including padded batch rows), pad batch to a
    # multiple of 8 sublanes.
    xt = jnp.transpose(x_nchw, (2, 3, 0, 1)).reshape(p, n, c)
    buf = jnp.zeros((p, npad, K_PAD), jnp.float32)
    buf = buf.at[:, :, ONES_IN].set(1.0)
    buf = buf.at[:, :n, :c].set(xt)
    x_in = buf.reshape(p * npad, K_PAD)

    out_pad = pl.pallas_call(
        functools.partial(cnn_fused_kernel, npad=npad),
        out_shape=jax.ShapeDtypeStruct((npad, LANE), jnp.float32),
        in_specs=[pl.BlockSpec(memory_space=pltpu.MemorySpace.VMEM)] * 4,
        out_specs=pl.BlockSpec(memory_space=pltpu.MemorySpace.VMEM),
    )(x_in, wc, w1, w2)

    return out_pad[:n, :FC2_OUT]


# ----------------------------------------------------------------------------- params
def init_params(key):
    """PyTorch-default-style uniform(-1/sqrt(fan_in)) init, snapped to the bf16 grid.

    Weights are deployed to the kernel in bfloat16; snapping the f32 params to the
    bf16 grid once means the pure-JAX reference and the kernel use identical
    effective weights, so the self-check measures kernel math only.
    Conv weights stored as (Cin, Cout) (torch weight[:, :, 0, 0].T), fc weights as
    (in, out) (torch weight.T)."""
    def q(a):
        return a.astype(jnp.bfloat16).astype(jnp.float32)

    convs = []
    for (cin, cout) in CONV_DIMS:
        key, kw, kb = jax.random.split(key, 3)
        bound = 1.0 / (cin ** 0.5)
        wgt = q(jax.random.uniform(kw, (cin, cout), jnp.float32, -bound, bound))
        bias = q(jax.random.uniform(kb, (cout,), jnp.float32, -bound, bound))
        convs.append((wgt, bias))
    key, k1, k2, k3, k4 = jax.random.split(key, 5)
    b1 = 1.0 / (FC1_IN ** 0.5)
    fw1 = q(jax.random.uniform(k1, (FC1_IN, FC1_OUT), jnp.float32, -b1, b1))
    fb1 = q(jax.random.uniform(k2, (FC1_OUT,), jnp.float32, -b1, b1))
    b2 = 1.0 / (FC1_OUT ** 0.5)
    fw2 = q(jax.random.uniform(k3, (FC1_OUT, FC2_OUT), jnp.float32, -b2, b2))
    fb2 = q(jax.random.uniform(k4, (FC2_OUT,), jnp.float32, -b2, b2))
    return {"convs": convs, "fc": (fw1, fb1, fw2, fb2)}


def pack_params(params):
    """One-time offline packing into the compact bf16 kernel layout."""
    # Conv weights: (6, 32, 128); bias in row 31; [31,31]=1 keeps the ones lane alive.
    wc = jnp.zeros((N_CONV, K_PAD, LANE), jnp.float32)
    for i, ((cin, cout), (wgt, bias)) in enumerate(zip(CONV_DIMS, params["convs"])):
        wc = wc.at[i, :cin, :cout].set(wgt)
        wc = wc.at[i, ONES_IN, :cout].set(bias)
        wc = wc.at[i, ONES_IN, ONES_IN].set(1.0)

    fw1, fb1, fw2, fb2 = params["fc"]
    # fc1: torch flat index is c*25 + p (channel-major).  Split into per-pixel
    # (Cin=18, 100) blocks so the kernel never has to transpose/reshape.
    w1 = jnp.zeros((P, K_PAD, LANE), jnp.float32)
    w1 = w1.at[:, :C_OUT, :FC1_OUT].set(
        jnp.transpose(fw1.reshape(C_OUT, P, FC1_OUT), (1, 0, 2)))
    w1 = w1.at[0, ONES_IN, :FC1_OUT].set(fb1)   # fc1 bias folded into pixel-0 block
    w1 = w1.at[0, ONES_IN, ONES_FC].set(1.0)    # ones lane (lane 100) for fc2 bias

    w2 = jnp.zeros((LANE, LANE), jnp.float32)
    w2 = w2.at[:FC1_OUT, :FC2_OUT].set(fw2)
    w2 = w2.at[ONES_FC, :FC2_OUT].set(fb2)

    return (wc.astype(jnp.bfloat16), w1.astype(jnp.bfloat16),
            w2.astype(jnp.bfloat16))


# ----------------------------------------------------------------------------- reference
def reference_forward(x_nchw, params):
    """Plain-JAX replica of the PyTorch module, full f32 / HIGHEST precision."""
    hi = jax.lax.Precision.HIGHEST
    h = x_nchw
    for (wgt, bias) in params["convs"]:
        h = jax.nn.relu(
            jnp.einsum("nchw,cd->ndhw", h, wgt, precision=hi)
            + bias.reshape(1, -1, 1, 1))
    flat = h.reshape(h.shape[0], -1)              # channel-major, matches x.view(N,-1)
    fw1, fb1, fw2, fb2 = params["fc"]
    h1 = jax.nn.relu(jnp.dot(flat, fw1, precision=hi) + fb1)
    return jnp.dot(h1, fw2, precision=hi) + fb2


# ----------------------------------------------------------------------------- main
if __name__ == "__main__":
    key = jax.random.PRNGKey(0)
    key, kx, kp = jax.random.split(key, 3)

    # Input matches the module: NCHW, 3 channels, 5x5 spatial (25*18 fc1 in), batch 2.
    x = jax.random.normal(kx, (2, C_IN, H, W), dtype=jnp.float32)
    params = init_params(kp)
    wc, w1, w2 = pack_params(params)

    out = cnn_forward(x, wc, w1, w2)
    jax.block_until_ready(out)

    assert out.shape == (2, FC2_OUT) and out.dtype == jnp.float32
    ref = reference_forward(x, params)
    # Tolerance budget: kernel casts activations to bf16 before each of the 8 MXU
    # contractions (~0.2% relative per cast, f32 accumulation); weights are shared
    # bf16-exact values, so 1e-2 leaves a wide margin over the ~1e-3 expected error
    # while still catching any layout/bias-folding bug (those are O(0.1+)).
    assert jnp.allclose(out, ref, atol=1e-2, rtol=1e-2), (out, ref)
    print("KERNEL_OK")
</pallas_src>

<mosaic_0001>
module attributes {stable_mosaic.version = 11 : i64} {
  func.func @cnn_fused_kernel(%arg0: memref<200x32xf32, #tpu.memory_space<vmem>>, %arg1: memref<6x32x128xbf16, #tpu.memory_space<vmem>>, %arg2: memref<25x32x128xbf16, #tpu.memory_space<vmem>>, %arg3: memref<128x128xbf16, #tpu.memory_space<vmem>>, %arg4: memref<8x128xf32, #tpu.memory_space<vmem>>) attributes {dimension_semantics = [], scalar_prefetch = 0 : i64, scratch_operands = 0 : i64, tpu.core_type = #tpu.core_type<tc>} {
    %c0 = arith.constant 0 : index
    %c0_0 = arith.constant 0 : index
    %0 = vector.load %arg0[%c0, %c0_0] : memref<200x32xf32, #tpu.memory_space<vmem>>, vector<200x32xf32>
    %1 = arith.truncf %0 : vector<200x32xf32> to vector<200x32xbf16>
    %c0_1 = arith.constant 0 : index
    %c0_2 = arith.constant 0 : index
    %c0_3 = arith.constant 0 : index
    %2 = vector.load %arg1[%c0_1, %c0_2, %c0_3] : memref<6x32x128xbf16, #tpu.memory_space<vmem>>, vector<1x32x128xbf16>
    %3 = vector.shape_cast %2 : vector<1x32x128xbf16> to vector<32x128xbf16>
    %cst = arith.constant dense<0.000000e+00> : vector<200x128xf32>
    %4 = tpu.matmul %1, %3, %cst {dimension_numbers = #tpu.dot_dimension_numbers<[1], [0], [0], [1], [0, 0, 1, 1], [], []>} : vector<200x32xbf16>, vector<32x128xbf16>, vector<200x128xf32> -> vector<200x128xf32>
    %cst_4 = arith.constant 0.000000e+00 : f32
    %5 = vector.broadcast %cst_4 : f32 to vector<200x128xf32>
    %6 = arith.maximumf %4, %5 : vector<200x128xf32>
    %7 = vector.extract_strided_slice %6 {offsets = [0, 0], sizes = [200, 32], strides = [1, 1]} : vector<200x128xf32> to vector<200x32xf32>
    %8 = arith.truncf %7 : vector<200x32xf32> to vector<200x32xbf16>
    %c1 = arith.constant 1 : index
    %c0_5 = arith.constant 0 : index
    %c0_6 = arith.constant 0 : index
    %9 = vector.load %arg1[%c1, %c0_5, %c0_6] : memref<6x32x128xbf16, #tpu.memory_space<vmem>>, vector<1x32x128xbf16>
    %10 = vector.shape_cast %9 : vector<1x32x128xbf16> to vector<32x128xbf16>
    %cst_7 = arith.constant dense<0.000000e+00> : vector<200x128xf32>
    %11 = tpu.matmul %8, %10, %cst_7 {dimension_numbers = #tpu.dot_dimension_numbers<[1], [0], [0], [1], [0, 0, 1, 1], [], []>} : vector<200x32xbf16>, vector<32x128xbf16>, vector<200x128xf32> -> vector<200x128xf32>
    %cst_8 = arith.constant 0.000000e+00 : f32
    %12 = vector.broadcast %cst_8 : f32 to vector<200x128xf32>
    %13 = arith.maximumf %11, %12 : vector<200x128xf32>
    %14 = vector.extract_strided_slice %13 {offsets = [0, 0], sizes = [200, 32], strides = [1, 1]} : vector<200x128xf32> to vector<200x32xf32>
    %15 = arith.truncf %14 : vector<200x32xf32> to vector<200x32xbf16>
    %c2 = arith.constant 2 : index
    %c0_9 = arith.constant 0 : index
    %c0_10 = arith.constant 0 : index
    %16 = vector.load %arg1[%c2, %c0_9, %c0_10] : memref<6x32x128xbf16, #tpu.memory_space<vmem>>, vector<1x32x128xbf16>
    %17 = vector.shape_cast %16 : vector<1x32x128xbf16> to vector<32x128xbf16>
    %cst_11 = arith.constant dense<0.000000e+00> : vector<200x128xf32>
    %18 = tpu.matmul %15, %17, %cst_11 {dimension_numbers = #tpu.dot_dimension_numbers<[1], [0], [0], [1], [0, 0, 1, 1], [], []>} : vector<200x32xbf16>, vector<32x128xbf16>, vector<200x128xf32> -> vector<200x128xf32>
    %cst_12 = arith.constant 0.000000e+00 : f32
    %19 = vector.broadcast %cst_12 : f32 to vector<200x128xf32>
    %20 = arith.maximumf %18, %19 : vector<200x128xf32>
    %21 = vector.extract_strided_slice %20 {offsets = [0, 0], sizes = [200, 32], strides = [1, 1]} : vector<200x128xf32> to vector<200x32xf32>
    %22 = arith.truncf %21 : vector<200x32xf32> to vector<200x32xbf16>
    %c3 = arith.constant 3 : index
    %c0_13 = arith.constant 0 : index
    %c0_14 = arith.constant 0 : index
    %23 = vector.load %arg1[%c3, %c0_13, %c0_14] : memref<6x32x128xbf16, #tpu.memory_space<vmem>>, vector<1x32x128xbf16>
    %24 = vector.shape_cast %23 : vector<1x32x128xbf16> to vector<32x128xbf16>
    %cst_15 = arith.constant dense<0.000000e+00> : vector<200x128xf32>
    %25 = tpu.matmul %22, %24, %cst_15 {dimension_numbers = #tpu.dot_dimension_numbers<[1], [0], [0], [1], [0, 0, 1, 1], [], []>} : vector<200x32xbf16>, vector<32x128xbf16>, vector<200x128xf32> -> vector<200x128xf32>
    %cst_16 = arith.constant 0.000000e+00 : f32
    %26 = vector.broadcast %cst_16 : f32 to vector<200x128xf32>
    %27 = arith.maximumf %25, %26 : vector<200x128xf32>
    %28 = vector.extract_strided_slice %27 {offsets = [0, 0], sizes = [200, 32], strides = [1, 1]} : vector<200x128xf32> to vector<200x32xf32>
    %29 = arith.truncf %28 : vector<200x32xf32> to vector<200x32xbf16>
    %c4 = arith.constant 4 : index
    %c0_17 = arith.constant 0 : index
    %c0_18 = arith.constant 0 : index
    %30 = vector.load %arg1[%c4, %c0_17, %c0_18] : memref<6x32x128xbf16, #tpu.memory_space<vmem>>, vector<1x32x128xbf16>
    %31 = vector.shape_cast %30 : vector<1x32x128xbf16> to vector<32x128xbf16>
    %cst_19 = arith.constant dense<0.000000e+00> : vector<200x128xf32>
    %32 = tpu.matmul %29, %31, %cst_19 {dimension_numbers = #tpu.dot_dimension_numbers<[1], [0], [0], [1], [0, 0, 1, 1], [], []>} : vector<200x32xbf16>, vector<32x128xbf16>, vector<200x128xf32> -> vector<200x128xf32>
    %cst_20 = arith.constant 0.000000e+00 : f32
    %33 = vector.broadcast %cst_20 : f32 to vector<200x128xf32>
    %34 = arith.maximumf %32, %33 : vector<200x128xf32>
    %35 = vector.extract_strided_slice %34 {offsets = [0, 0], sizes = [200, 32], strides = [1, 1]} : vector<200x128xf32> to vector<200x32xf32>
    %36 = arith.truncf %35 : vector<200x32xf32> to vector<200x32xbf16>
    %c5 = arith.constant 5 : index
    %c0_21 = arith.constant 0 : index
    %c0_22 = arith.constant 0 : index
    %37 = vector.load %arg1[%c5, %c0_21, %c0_22] : memref<6x32x128xbf16, #tpu.memory_space<vmem>>, vector<1x32x128xbf16>
    %38 = vector.shape_cast %37 : vector<1x32x128xbf16> to vector<32x128xbf16>
    %cst_23 = arith.constant dense<0.000000e+00> : vector<200x128xf32>
    %39 = tpu.matmul %36, %38, %cst_23 {dimension_numbers = #tpu.dot_dimension_numbers<[1], [0], [0], [1], [0, 0, 1, 1], [], []>} : vector<200x32xbf16>, vector<32x128xbf16>, vector<200x128xf32> -> vector<200x128xf32>
    %cst_24 = arith.constant 0.000000e+00 : f32
    %40 = vector.broadcast %cst_24 : f32 to vector<200x128xf32>
    %41 = arith.maximumf %39, %40 : vector<200x128xf32>
    %42 = vector.shape_cast %41 : vector<200x128xf32> to vector<25x8x128xf32>
    %43 = vector.extract_strided_slice %42 {offsets = [0, 0, 0], sizes = [25, 8, 32], strides = [1, 1, 1]} : vector<25x8x128xf32> to vector<25x8x32xf32>
    %44 = arith.truncf %43 : vector<25x8x32xf32> to vector<25x8x32xbf16>
    %c0_25 = arith.constant 0 : index
    %c0_26 = arith.constant 0 : index
    %c0_27 = arith.constant 0 : index
    %45 = vector.load %arg2[%c0_25, %c0_26, %c0_27] : memref<25x32x128xbf16, #tpu.memory_space<vmem>>, vector<25x32x128xbf16>
    %cst_28 = arith.constant dense<0.000000e+00> : vector<25x8x128xf32>
    %46 = tpu.matmul %44, %45, %cst_28 {dimension_numbers = #tpu.dot_dimension_numbers<[2], [1], [1], [2], [0, 0, 0, 1, 1, 2], [0], [0]>} : vector<25x8x32xbf16>, vector<25x32x128xbf16>, vector<25x8x128xf32> -> vector<25x8x128xf32>
    %cst_29 = arith.constant dense<0.000000e+00> : vector<8x128xf32>
    %47 = vector.multi_reduction <add>, %46, %cst_29 [0] : vector<25x8x128xf32> to vector<8x128xf32>
    %cst_30 = arith.constant 0.000000e+00 : f32
    %48 = vector.broadcast %cst_30 : f32 to vector<8x128xf32>
    %49 = arith.maximumf %47, %48 : vector<8x128xf32>
    %50 = arith.truncf %49 : vector<8x128xf32> to vector<8x128xbf16>
    %c0_31 = arith.constant 0 : index
    %c0_32 = arith.constant 0 : index
    %51 = vector.load %arg3[%c0_31, %c0_32] : memref<128x128xbf16, #tpu.memory_space<vmem>>, vector<128x128xbf16>
    %cst_33 = arith.constant dense<0.000000e+00> : vector<8x128xf32>
    %52 = tpu.matmul %50, %51, %cst_33 {dimension_numbers = #tpu.dot_dimension_numbers<[1], [0], [0], [1], [0, 0, 1, 1], [], []>} : vector<8x128xbf16>, vector<128x128xbf16>, vector<8x128xf32> -> vector<8x128xf32>
    %c0_34 = arith.constant 0 : index
    %c0_35 = arith.constant 0 : index
    %53 = vector.load %arg4[%c0_34, %c0_35] : memref<8x128xf32, #tpu.memory_space<vmem>>, vector<8x128xf32>
    tpu.vector_store %arg4[%c0_34, %c0_35], %52 {strides = array<i32>} : memref<8x128xf32, #tpu.memory_space<vmem>>, vector<8x128xf32>,
    return
  }
}

</mosaic_0001>

<bundles_post_ra>
// kernel: cnn_forward.1
= control target key start
LH: loop header
LB: loop body
LE: loop exit
PB: predicated region body
PF: predicated region fallthrough
CT: control target
= control target key end

     0   :  { %9 = vsyncpa [#allocation3], 0  ;;  %s4195_s15 = smov [#allocation2]   ;;  %s4815_s0 = inlined_call_operand.vmem [shape: f32[200,32], index: 0, kind: input, shape index: {}]   ;;  %s4816_s1 = inlined_call_operand.vmem [shape: bf16[6,32,128], index: 1, kind: input, shape index: {}]   ;;  %s4817_s2 = inlined_call_operand.hbm [shape: bf16[25,32,128], index: 2, kind: input, shape index: {}]   ;;  %s4818_s3 = inlined_call_operand.vmem [shape: bf16[128,128], index: 3, kind: input, shape index: {}]   ;;  %s4819_s4 = inlined_call_operand.vmem [shape: f32[8,128], index: 4, kind: output, shape index: {}]  }
   0x1   :  { %s19_s16 = sshll.u32 %s4195_s15, 4  ;;  %s4171_s19 = scalar_lea.hbm %s4817_s2, 6400  ;;  %s20_s16 = int_to_ptr.vmem [resolvable:$true] %s19_s16 }
   0x2   :  { %p4172_p0 = scmp.ne.s32.totalorder %s4817_s2, %s4171_s19  ;;  %p4175_p1 = scmp.lt.u32.totalorder %s4171_s19, %s4817_s2 }
   0x4   :  { %p4177_p2 = pnand %p4175_p1, %p4172_p0 }
   0x6   :  { %4180 = shalt.err (!%p4177_p2)
}
   0x7   :  { %s4181_s24 = scalar_lea.vmem %s20_s16, 6400  ;;  %p4186_p4 = scmp.lt.s32.totalorder %s20_s16, %s20_s16 }
   0x8   :  { %p4182_p3 = scmp.ne.s32.totalorder %s20_s16, %s4181_s24  ;;  %p4187_p5 = scmp.lt.s32.totalorder %s4181_s24, %s4181_s24 }
   0xa   :  { %p4188_p6 = por %p4187_p5, %p4186_p4 }
   0xc   :  { %p4189_p7 = pnand %p4188_p6, %p4182_p3 }
   0xe   :  { %4192 = shalt.err (!%p4189_p7)
}
   0xf   :  { %s4196_s25 = smov 64   ;;  %s4197_s26 = smov 4  }
  0x10   :  { %25 = dma.hbm_to_vmem [thread:$0]  %s4817_s2, 6400, %s20_s16, [#allocation3], %s4196_s25, %s4196_s25, %s4197_s26  }
  0x11   :  { %4193 = dma.done.wait [#allocation3], 6400  }
  0x12   :  { %4194 = vsyncadd [#allocation3], 4294960896  ;;  %v4198_v0 = vmov 0.0   ;;  %vm4199_vm0 = vmmov 0   ;;  %v4101_v1 = vld [vmem:[%s4816_s1] sm:$0xff]   ;;  %v4102_v2 = vld [vmem:[%s4816_s1 + $0x8] sm:$0xff]  }
  0x13   :  { %3440 = vmatprep.subr.bf16.mxu0 %v4198_v0  ;;  %3444 = vmatprep.mubr.msk.bf16.mxu0 %vm4199_vm0, %v4198_v0  ;;  %v32_v3 = vld [vmem:[%s4815_s0] sm:$0xff]  ;;  %v33_v4 = vld [vmem:[%s4815_s0 + $0x8] sm:$0xff]  ;;  %v34_v5 = vld [vmem:[%s4815_s0 + $0x10] sm:$0xff]  ;;  %vm86_vm1 = vcmask 261120  }
  0x14   :  { %3996 = vmatprep.subr.bf16.mxu1 %v4198_v0  ;;  %3448 = vmatprep.mubr.msk.bf16.mxu1 %vm4199_vm0, %v4198_v0  ;;  %v35_v6 = vld [vmem:[%s4815_s0 + $0x18] sm:$0xff]  ;;  %v57_v7 = vpack.c.bf16 %v33_v4, %v32_v3  ;;  %v4103_v9 = vld [vmem:[%s4816_s1 + $0x10] sm:$0xff]   ;;  %v36_v10 = vld [vmem:[%s4815_s0 + $0x20] sm:$0xff] }
  0x15   :  { %3441 = vmatpush3.bf16.msra.mxu0 %v4101_v1  ;;  %3998 = vmatpush3.bf16.msra.mxu1 %v4101_v1  ;;  %v58_v8 = vpack.c.bf16 %v35_v6, %v34_v5  ;;  %v37_v11 = vld [vmem:[%s4815_s0 + $0x28] sm:$0xff]  ;;  %v4104_v12 = vld [vmem:[%s4816_s1 + $0x18] sm:$0xff]   ;;  %v38_v14 = vld [vmem:[%s4815_s0 + $0x30] sm:$0xff] }
  0x16   :  { %3442 = vmatprep.subr.bf16.mxu0 %v4198_v0  ;;  %3997 = vmatprep.subr.bf16.mxu1 %v4198_v0  ;;  %v59_v13 = vpack.c.bf16 %v37_v11, %v36_v10  ;;  %v39_v15 = vld [vmem:[%s4815_s0 + $0x38] sm:$0xff]  ;;  %v40_v17 = vld [vmem:[%s4815_s0 + $0x40] sm:$0xff]  ;;  %v41_v18 = vld [vmem:[%s4815_s0 + $0x48] sm:$0xff] }
  0x17   :  { %v60_v16 = vpack.c.bf16 %v39_v15, %v38_v14  ;;  %v61_v19 = vpack.c.bf16 %v41_v18, %v40_v17  ;;  %v42_v20 = vld [vmem:[%s4815_s0 + $0x50] sm:$0xff]  ;;  %v43_v21 = vld [vmem:[%s4815_s0 + $0x58] sm:$0xff]  ;;  %v44_v23 = vld [vmem:[%s4815_s0 + $0x60] sm:$0xff] }
  0x18   :  { %v62_v22 = vpack.c.bf16 %v43_v21, %v42_v20  ;;  %v45_v24 = vld [vmem:[%s4815_s0 + $0x68] sm:$0xff]  ;;  %v46_v26 = vld [vmem:[%s4815_s0 + $0x70] sm:$0xff]  ;;  %v47_v27 = vld [vmem:[%s4815_s0 + $0x78] sm:$0xff] }
  0x19   :  { %3443 = vmatpush3.bf16.msra.mxu0 %v4102_v2  ;;  %3999 = vmatpush3.bf16.msra.mxu1 %v4102_v2  ;;  %v63_v25 = vpack.c.bf16 %v45_v24, %v44_v23  ;;  %v64_v28 = vpack.c.bf16 %v47_v27, %v46_v26  ;;  %v48_v29 = vld [vmem:[%s4815_s0 + $0x80] sm:$0xff]  ;;  %v49_v30 = vld [vmem:[%s4815_s0 + $0x88] sm:$0xff]  ;;  %v50_v32 = vld [vmem:[%s4815_s0 + $0x90] sm:$0xff] }
  0x1a   :  { %3496 = vmatprep.subr.bf16.mxu1 %v4198_v0  ;;  %3552 = vmatprep.subr.bf16.mxu0 %v4198_v0  ;;  %v65_v31 = vpack.c.bf16 %v49_v30, %v48_v29  ;;  %v51_v33 = vld [vmem:[%s4815_s0 + $0x98] sm:$0xff]  ;;  %v52_v35 = vld [vmem:[%s4815_s0 + $0xa0] sm:$0xff]  ;;  %v53_v36 = vld [vmem:[%s4815_s0 + $0xa8] sm:$0xff] }
  0x1b   :  { %v66_v34 = vpack.c.bf16 %v51_v33, %v50_v32  ;;  %v67_v37 = vpack.c.bf16 %v53_v36, %v52_v35  ;;  %v54_v38 = vld [vmem:[%s4815_s0 + $0xb0] sm:$0xff]  ;;  %v55_v39 = vld [vmem:[%s4815_s0 + $0xb8] sm:$0xff]  ;;  %v56_v41 = vld [vmem:[%s4815_s0 + $0xc0] sm:$0xff] }
  0x1c   :  { %3445 = vmatmul.mubr.msk.bf16.vlgmr.msra.gmra.mrb[0].mxu0 %vm86_vm1, %v57_v7  ;;  %3449 = vmatmul.mubr.msk.bf16.vlgmr.msra.gmra.mrb[0].mxu1 %vm86_vm1, %v58_v8  ;;  %v68_v40 = vpack.c.bf16 %v55_v39, %v54_v38  ;;  %v69_v42 = vpack.c.bf16 %v56_v41, %v56_v41  ;;  %v4105_v43 = vld [vmem:[%s4816_s1 + $0x20] sm:$0xff]  }
  0x1d   :  { %3452 = vmatprep.mubr.msk.bf16.mxu1 %vm4199_vm0, %v4198_v0  ;;  %3497 = vmatpush3.bf16.msra.mxu1 %v4103_v9 }
  0x1e   :  { %3498 = vmatprep.subr.bf16.mxu1 %v4198_v0  ;;  %3556 = vmatprep.mubr.msk.bf16.mxu0 %vm4199_vm0, %v4198_v0 }
  0x1f   :  { %3553 = vmatpush3.bf16.msra.mxu0 %v4105_v43 }
  0x20   :  { %3554 = vmatprep.subr.bf16.mxu0 %v4198_v0 }
  0x21   :  { %3499 = vmatpush3.bf16.msra.mxu1 %v4104_v12 }
  0x22   :  { %3608 = vmatprep.subr.bf16.mxu1 %v4198_v0 }
  0x24   :  { %3453 = vmatmul.mubr.msk.bf16.gmra.mrb[4].mxu1 %vm86_vm1, %v59_v13 }
  0x25   :  { %3456 = vmatprep.mubr.msk.bf16.mxu1 %vm4199_vm0, %v4198_v0 }
  0x2c   :  { %3457 = vmatmul.mubr.msk.bf16.gmra.mrb[8].mxu1 %vm86_vm1, %v60_v16 }
  0x2d   :  { %3460 = vmatprep.mubr.msk.bf16.mxu1 %vm4199_vm0, %v4198_v0 }
  0x34   :  { %3461 = vmatmul.mubr.msk.bf16.gmra.mrb[12].mxu1 %vm86_vm1, %v61_v19 }
  0x35   :  { %3464 = vmatprep.mubr.msk.bf16.mxu1 %vm4199_vm0, %v4198_v0 }
  0x3c   :  { %3465 = vmatmul.mubr.msk.bf16.gmra.mrb[16].mxu1 %vm86_vm1, %v62_v22 }
  0x3d   :  { %3468 = vmatprep.mubr.msk.bf16.mxu1 %vm4199_vm0, %v4198_v0 }
  0x44   :  { %3469 = vmatmul.mubr.msk.bf16.gmra.mrb[20].mxu1 %vm86_vm1, %v63_v25 }
  0x45   :  { %3472 = vmatprep.mubr.msk.bf16.mxu1 %vm4199_vm0, %v4198_v0 }
  0x4c   :  { %3473 = vmatmul.mubr.msk.bf16.gmra.mrb[24].mxu1 %vm86_vm1, %v64_v28 }
  0x4d   :  { %3476 = vmatprep.mubr.msk.bf16.mxu1 %vm4199_vm0, %v4198_v0 }
  0x54   :  { %3477 = vmatmul.mubr.msk.bf16.gmra.mrb[28].mxu1 %vm86_vm1, %v65_v31 }
  0x55   :  { %3480 = vmatprep.mubr.msk.bf16.mxu1 %vm4199_vm0, %v4198_v0 }
  0x5c   :  { %3481 = vmatmul.mubr.msk.bf16.gmra.mrb[32].mxu1 %vm86_vm1, %v66_v34 }
  0x5d   :  { %3484 = vmatprep.mubr.msk.bf16.mxu1 %vm4199_vm0, %v4198_v0 }
  0x64   :  { %3485 = vmatmul.mubr.msk.bf16.gmra.mrb[36].mxu1 %vm86_vm1, %v67_v37 }
  0x65   :  { %3488 = vmatprep.mubr.msk.bf16.mxu1 %vm4199_vm0, %v4198_v0 }
  0x6c   :  { %3489 = vmatmul.mubr.msk.bf16.gmra.mrb[40].mxu1 %vm86_vm1, %v68_v40 }
  0x6d   :  { %3492 = vmatprep.mubr.msk.bf16.mxu1 %vm4199_vm0, %v4198_v0 }
  0x74   :  { %3493 = vmatmul.mubr.msk.bf16.gmra.mrb[44].mxu1 %vm86_vm1, %v69_v42 }
  0x75   :  { %3500 = vmatprep.mubr.msk.bf16.mxu1 %vm4199_vm0, %v4198_v0 }
  0xef   :  { %v160_v44 = vpop.f32.mrb[0].mxu0  ;;  %v168_v45 = vpop.f32.mrb[0].mxu1 }
  0xf0   :  { %v3446_v46 = vpop.f32.mrb[1].mxu0  ;;  %v264_v47 = vmax.f32 %v168_v45, 0.0  ;;  %v3450_v48 = vpop.f32.mrb[1].mxu1  ;;  %v262_v51 = vmax.f32 %v160_v44, 0.0 }
  0xf1   :  { %v163_v49 = vpop.f32.mrb[2].mxu0  ;;  %v171_v50 = vpop.f32.mrb[2].mxu1 }
  0xf2   :  { %v263_v52 = vmax.f32 %v163_v49, 0.0  ;;  %v3447_v53 = vpop.f32.mrb[3].mxu0  ;;  %v265_v54 = vmax.f32 %v171_v50, 0.0  ;;  %v3451_v55 = vpop.f32.mrb[3].mxu1 }
  0xf4   :  { %v287_v56 = vpack.c.bf16 %v263_v52, %v262_v51  ;;  %v288_v57 = vpack.c.bf16 %v265_v54, %v264_v47 }
  0xf6   :  { %3501 = vmatmul.mubr.msk.bf16.vlgmr.msra.gmra.mrb[48].mxu1 %vm86_vm1, %v287_v56 }
  0xf7   :  { %3504 = vmatprep.mubr.msk.bf16.mxu1 %vm4199_vm0, %v4198_v0  ;;  %v176_v58 = vpop.f32.mrb[4].mxu1 }
  0xf8   :  { %v266_v59 = vmax.f32 %v176_v58, 0.0  ;;  %v3454_v60 = vpop.f32.mrb[5].mxu1 }
  0xf9   :  { %v179_v61 = vpop.f32.mrb[6].mxu1 }
  0xfa   :  { %v267_v62 = vmax.f32 %v179_v61, 0.0  ;;  %v3455_v63 = vpop.f32.mrb[7].mxu1 }
  0xfc   :  { %v289_v1 = vpack.c.bf16 %v267_v62, %v266_v59 }
  0xfe   :  { %3505 = vmatmul.mubr.msk.bf16.gmra.mrb[52].mxu1 %vm86_vm1, %v288_v57 }
  0xff   :  { %3508 = vmatprep.mubr.msk.bf16.mxu1 %vm4199_vm0, %v4198_v0  ;;  %v184_v2 = vpop.f32.mrb[8].mxu1 }
 0x100   :  { %v268_v3 = vmax.f32 %v184_v2, 0.0  ;;  %v3458_v4 = vpop.f32.mrb[9].mxu1 }
 0x101   :  { %v187_v5 = vpop.f32.mrb[10].mxu1 }
 0x102   :  { %v269_v6 = vmax.f32 %v187_v5, 0.0  ;;  %v3459_v7 = vpop.f32.mrb[11].mxu1 }
 0x104   :  { %v290_v8 = vpack.c.bf16 %v269_v6, %v268_v3  ;;  %v4106_v6 = vld [vmem:[%s4816_s1 + $0x28] sm:$0xff]  }
 0x105   :  { %3555 = vmatpush3.bf16.msra.mxu0 %v4106_v6 }
 0x106   :  { %3509 = vmatmul.mubr.msk.bf16.gmra.mrb[56].mxu1 %vm86_vm1, %v289_v1  ;;  %3664 = vmatprep.subr.bf16.mxu0 %v4198_v0 }
 0x107   :  { %3512 = vmatprep.mubr.msk.bf16.mxu1 %vm4199_vm0, %v4198_v0  ;;  %v192_v9 = vpop.f32.mrb[12].mxu1 }
 0x108   :  { %v270_v10 = vmax.f32 %v192_v9, 0.0  ;;  %v3462_v11 = vpop.f32.mrb[13].mxu1  ;;  %v4107_v9 = vld [vmem:[%s4816_s1 + $0x30] sm:$0xff]  }
 0x109   :  { %v195_v12 = vpop.f32.mrb[14].mxu1  ;;  %3609 = vmatpush3.bf16.msra.mxu1 %v4107_v9 }
 0x10a   :  { %v271_v13 = vmax.f32 %v195_v12, 0.0  ;;  %v3463_v14 = vpop.f32.mrb[15].mxu1  ;;  %3610 = vmatprep.subr.bf16.mxu1 %v4198_v0 }
 0x10c   :  { %v291_v15 = vpack.c.bf16 %v271_v13, %v270_v10  ;;  %v4108_v10 = vld [vmem:[%s4816_s1 + $0x38] sm:$0xff]  }
 0x10d   :  { %3611 = vmatpush3.bf16.msra.mxu1 %v4108_v10 }
 0x10e   :  { %3513 = vmatmul.mubr.msk.bf16.gmra.mrb[60].mxu1 %vm86_vm1, %v290_v8  ;;  %3720 = vmatprep.subr.bf16.mxu1 %v4198_v0 }
 0x10f   :  { %3516 = vmatprep.mubr.msk.bf16.mxu1 %vm4199_vm0, %v4198_v0  ;;  %v200_v16 = vpop.f32.mrb[16].mxu1 }
 0x110   :  { %v272_v17 = vmax.f32 %v200_v16, 0.0  ;;  %v3466_v18 = vpop.f32.mrb[17].mxu1 }
 0x111   :  { %v203_v19 = vpop.f32.mrb[18].mxu1 }
 0x112   :  { %v273_v20 = vmax.f32 %v203_v19, 0.0  ;;  %v3467_v21 = vpop.f32.mrb[19].mxu1 }
 0x114   :  { %v292_v22 = vpack.c.bf16 %v273_v20, %v272_v17 }
 0x116   :  { %3517 = vmatmul.mubr.msk.bf16.gmra.mrb[64].mxu1 %vm86_vm1, %v291_v15 }
 0x117   :  { %3520 = vmatprep.mubr.msk.bf16.mxu1 %vm4199_vm0, %v4198_v0  ;;  %v208_v23 = vpop.f32.mrb[20].mxu1 }
 0x118   :  { %v274_v24 = vmax.f32 %v208_v23, 0.0  ;;  %v3470_v25 = vpop.f32.mrb[21].mxu1 }
 0x119   :  { %v211_v26 = vpop.f32.mrb[22].mxu1 }
 0x11a   :  { %v275_v27 = vmax.f32 %v211_v26, 0.0  ;;  %v3471_v28 = vpop.f32.mrb[23].mxu1 }
 0x11c   :  { %v293_v29 = vpack.c.bf16 %v275_v27, %v274_v24 }
 0x11e   :  { %3521 = vmatmul.mubr.msk.bf16.gmra.mrb[68].mxu1 %vm86_vm1, %v292_v22 }
 0x11f   :  { %3524 = vmatprep.mubr.msk.bf16.mxu1 %vm4199_vm0, %v4198_v0  ;;  %v216_v30 = vpop.f32.mrb[24].mxu1 }
 0x120   :  { %v276_v31 = vmax.f32 %v216_v30, 0.0  ;;  %v3474_v32 = vpop.f32.mrb[25].mxu1 }
 0x121   :  { %v219_v33 = vpop.f32.mrb[26].mxu1 }
 0x122   :  { %v277_v34 = vmax.f32 %v219_v33, 0.0  ;;  %v3475_v35 = vpop.f32.mrb[27].mxu1 }
 0x124   :  { %v294_v36 = vpack.c.bf16 %v277_v34, %v276_v31 }
 0x126   :  { %3525 = vmatmul.mubr.msk.bf16.gmra.mrb[72].mxu1 %vm86_vm1, %v293_v29 }
 0x127   :  { %3528 = vmatprep.mubr.msk.bf16.mxu1 %vm4199_vm0, %v4198_v0  ;;  %v224_v37 = vpop.f32.mrb[28].mxu1 }
 0x128   :  { %v278_v38 = vmax.f32 %v224_v37, 0.0  ;;  %v3478_v39 = vpop.f32.mrb[29].mxu1 }
 0x129   :  { %v227_v40 = vpop.f32.mrb[30].mxu1 }
 0x12a   :  { %v279_v41 = vmax.f32 %v227_v40, 0.0  ;;  %v3479_v42 = vpop.f32.mrb[31].mxu1 }
 0x12c   :  { %v295_v43 = vpack.c.bf16 %v279_v41, %v278_v38 }
 0x12e   :  { %3529 = vmatmul.mubr.msk.bf16.gmra.mrb[76].mxu1 %vm86_vm1, %v294_v36 }
 0x12f   :  { %3532 = vmatprep.mubr.msk.bf16.mxu1 %vm4199_vm0, %v4198_v0  ;;  %v232_v44 = vpop.f32.mrb[32].mxu1 }
 0x130   :  { %v280_v45 = vmax.f32 %v232_v44, 0.0  ;;  %v3482_v46 = vpop.f32.mrb[33].mxu1 }
 0x131   :  { %v235_v47 = vpop.f32.mrb[34].mxu1 }
 0x132   :  { %v281_v48 = vmax.f32 %v235_v47, 0.0  ;;  %v3483_v49 = vpop.f32.mrb[35].mxu1 }
 0x134   :  { %v296_v50 = vpack.c.bf16 %v281_v48, %v280_v45 }
 0x136   :  { %3533 = vmatmul.mubr.msk.bf16.gmra.mrb[80].mxu1 %vm86_vm1, %v295_v43 }
 0x137   :  { %3536 = vmatprep.mubr.msk.bf16.mxu1 %vm4199_vm0, %v4198_v0  ;;  %v240_v51 = vpop.f32.mrb[36].mxu1 }
 0x138   :  { %v282_v52 = vmax.f32 %v240_v51, 0.0  ;;  %v3486_v53 = vpop.f32.mrb[37].mxu1 }
 0x139   :  { %v243_v54 = vpop.f32.mrb[38].mxu1 }
 0x13a   :  { %v283_v55 = vmax.f32 %v243_v54, 0.0  ;;  %v3487_v56 = vpop.f32.mrb[39].mxu1 }
 0x13c   :  { %v297_v57 = vpack.c.bf16 %v283_v55, %v282_v52 }
 0x13e   :  { %3537 = vmatmul.mubr.msk.bf16.gmra.mrb[84].mxu1 %vm86_vm1, %v296_v50 }
 0x13f   :  { %3540 = vmatprep.mubr.msk.bf16.mxu1 %vm4199_vm0, %v4198_v0  ;;  %v248_v58 = vpop.f32.mrb[40].mxu1 }
 0x140   :  { %v284_v59 = vmax.f32 %v248_v58, 0.0  ;;  %v3490_v60 = vpop.f32.mrb[41].mxu1 }
 0x141   :  { %v251_v61 = vpop.f32.mrb[42].mxu1 }
 0x142   :  { %v285_v62 = vmax.f32 %v251_v61, 0.0  ;;  %v3491_v63 = vpop.f32.mrb[43].mxu1 }
 0x144   :  { %v298_v1 = vpack.c.bf16 %v285_v62, %v284_v59 }
 0x146   :  { %3541 = vmatmul.mubr.msk.bf16.gmra.mrb[88].mxu1 %vm86_vm1, %v297_v57 }
 0x147   :  { %3544 = vmatprep.mubr.msk.bf16.mxu1 %vm4199_vm0, %v4198_v0  ;;  %v256_v2 = vpop.f32.mrb[44].mxu1 }
 0x148   :  { %v3494_v3 = vpop.f32.mrb[45].mxu1  ;;  %v286_v7 = vmax.f32 %v256_v2, 0.0 }
 0x149   :  { %v259_v4 = vpop.f32.mrb[46].mxu1 }
 0x14a   :  { %v3495_v5 = vpop.f32.mrb[47].mxu1  ;;  %v299_v8 = vpack.c.bf16 %v286_v7, %v286_v7 }
 0x14e   :  { %3545 = vmatmul.mubr.msk.bf16.gmra.mrb[92].mxu1 %vm86_vm1, %v298_v1 }
 0x14f   :  { %3548 = vmatprep.mubr.msk.bf16.mxu1 %vm4199_vm0, %v4198_v0 }
 0x156   :  { %3549 = vmatmul.mubr.msk.bf16.gmra.mrb[96].mxu1 %vm86_vm1, %v299_v8 }
 0x157   :  { %3612 = vmatprep.mubr.msk.bf16.mxu1 %vm4199_vm0, %v4198_v0 }
 0x1c9   :  { %v390_v11 = vpop.f32.mrb[48].mxu1 }
 0x1ca   :  { %v3502_v12 = vpop.f32.mrb[49].mxu1  ;;  %v492_v14 = vmax.f32 %v390_v11, 0.0 }
 0x1cb   :  { %v393_v13 = vpop.f32.mrb[50].mxu1 }
 0x1cc   :  { %v493_v15 = vmax.f32 %v393_v13, 0.0  ;;  %v3503_v16 = vpop.f32.mrb[51].mxu1 }
 0x1ce   :  { %v517_v17 = vpack.c.bf16 %v493_v15, %v492_v14 }
 0x1d0   :  { %3557 = vmatmul.mubr.msk.bf16.vlgmr.msra.gmra.mrb[4].mxu0 %vm86_vm1, %v517_v17 }
 0x1d1   :  { %v398_v18 = vpop.f32.mrb[52].mxu1  ;;  %3560 = vmatprep.mubr.msk.bf16.mxu0 %vm4199_vm0, %v4198_v0 }
 0x1d2   :  { %v494_v19 = vmax.f32 %v398_v18, 0.0  ;;  %v3506_v20 = vpop.f32.mrb[53].mxu1 }
 0x1d3   :  { %v401_v21 = vpop.f32.mrb[54].mxu1 }
 0x1d4   :  { %v495_v22 = vmax.f32 %v401_v21, 0.0  ;;  %v3507_v23 = vpop.f32.mrb[55].mxu1 }
 0x1d6   :  { %v518_v24 = vpack.c.bf16 %v495_v22, %v494_v19 }
 0x1d8   :  { %3561 = vmatmul.mubr.msk.bf16.gmra.mrb[8].mxu0 %vm86_vm1, %v518_v24 }
 0x1d9   :  { %v406_v25 = vpop.f32.mrb[56].mxu1  ;;  %3564 = vmatprep.mubr.msk.bf16.mxu0 %vm4199_vm0, %v4198_v0 }
 0x1da   :  { %v496_v26 = vmax.f32 %v406_v25, 0.0  ;;  %v3510_v27 = vpop.f32.mrb[57].mxu1 }
 0x1db   :  { %v409_v28 = vpop.f32.mrb[58].mxu1 }
 0x1dc   :  { %v497_v29 = vmax.f32 %v409_v28, 0.0  ;;  %v3511_v30 = vpop.f32.mrb[59].mxu1 }
 0x1de   :  { %v519_v31 = vpack.c.bf16 %v497_v29, %v496_v26 }
 0x1e0   :  { %3565 = vmatmul.mubr.msk.bf16.gmra.mrb[12].mxu0 %vm86_vm1, %v519_v31 }
 0x1e1   :  { %v414_v32 = vpop.f32.mrb[60].mxu1  ;;  %3568 = vmatprep.mubr.msk.bf16.mxu0 %vm4199_vm0, %v4198_v0 }
 0x1e2   :  { %v498_v33 = vmax.f32 %v414_v32, 0.0  ;;  %v3514_v34 = vpop.f32.mrb[61].mxu1 }
 0x1e3   :  { %v417_v35 = vpop.f32.mrb[62].mxu1 }
 0x1e4   :  { %v499_v36 = vmax.f32 %v417_v35, 0.0  ;;  %v3515_v37 = vpop.f32.mrb[63].mxu1 }
 0x1e6   :  { %v520_v38 = vpack.c.bf16 %v499_v36, %v498_v33 }
 0x1e8   :  { %3569 = vmatmul.mubr.msk.bf16.gmra.mrb[16].mxu0 %vm86_vm1, %v520_v38  ;;  %v4109_v38 = vld [vmem:[%s4816_s1 + $0x40] sm:$0xff]  }
 0x1e9   :  { %v422_v39 = vpop.f32.mrb[64].mxu1  ;;  %3572 = vmatprep.mubr.msk.bf16.mxu0 %vm4199_vm0, %v4198_v0  ;;  %3665 = vmatpush3.bf16.msra.mxu0 %v4109_v38 }
 0x1ea   :  { %v500_v40 = vmax.f32 %v422_v39, 0.0  ;;  %v3518_v41 = vpop.f32.mrb[65].mxu1  ;;  %3666 = vmatprep.subr.bf16.mxu0 %v4198_v0  ;;  %v4110_v39 = vld [vmem:[%s4816_s1 + $0x48] sm:$0xff]  }
 0x1eb   :  { %v425_v42 = vpop.f32.mrb[66].mxu1 }
 0x1ec   :  { %v501_v43 = vmax.f32 %v425_v42, 0.0  ;;  %v3519_v44 = vpop.f32.mrb[67].mxu1 }
 0x1ed   :  { %3667 = vmatpush3.bf16.msra.mxu0 %v4110_v39 }
 0x1ee   :  { %v521_v45 = vpack.c.bf16 %v501_v43, %v500_v40  ;;  %3776 = vmatprep.subr.bf16.mxu0 %v4198_v0 }
 0x1f0   :  { %3573 = vmatmul.mubr.msk.bf16.gmra.mrb[20].mxu0 %vm86_vm1, %v521_v45 }
 0x1f1   :  { %v430_v46 = vpop.f32.mrb[68].mxu1  ;;  %3576 = vmatprep.mubr.msk.bf16.mxu0 %vm4199_vm0, %v4198_v0 }
 0x1f2   :  { %v502_v47 = vmax.f32 %v430_v46, 0.0  ;;  %v3522_v48 = vpop.f32.mrb[69].mxu1 }
 0x1f3   :  { %v433_v49 = vpop.f32.mrb[70].mxu1 }
 0x1f4   :  { %v503_v50 = vmax.f32 %v433_v49, 0.0  ;;  %v3523_v51 = vpop.f32.mrb[71].mxu1 }
 0x1f6   :  { %v522_v52 = vpack.c.bf16 %v503_v50, %v502_v47 }
 0x1f8   :  { %3577 = vmatmul.mubr.msk.bf16.gmra.mrb[24].mxu0 %vm86_vm1, %v522_v52 }
 0x1f9   :  { %v438_v53 = vpop.f32.mrb[72].mxu1  ;;  %3580 = vmatprep.mubr.msk.bf16.mxu0 %vm4199_vm0, %v4198_v0 }
 0x1fa   :  { %v504_v54 = vmax.f32 %v438_v53, 0.0  ;;  %v3526_v55 = vpop.f32.mrb[73].mxu1 }
 0x1fb   :  { %v441_v56 = vpop.f32.mrb[74].mxu1 }
 0x1fc   :  { %v505_v57 = vmax.f32 %v441_v56, 0.0  ;;  %v3527_v58 = vpop.f32.mrb[75].mxu1 }
 0x1fe   :  { %v523_v59 = vpack.c.bf16 %v505_v57, %v504_v54 }
 0x200   :  { %3581 = vmatmul.mubr.msk.bf16.gmra.mrb[28].mxu0 %vm86_vm1, %v523_v59 }
 0x201   :  { %v446_v60 = vpop.f32.mrb[76].mxu1  ;;  %3584 = vmatprep.mubr.msk.bf16.mxu0 %vm4199_vm0, %v4198_v0 }
 0x202   :  { %v506_v61 = vmax.f32 %v446_v60, 0.0  ;;  %v3530_v62 = vpop.f32.mrb[77].mxu1 }
 0x203   :  { %v449_v63 = vpop.f32.mrb[78].mxu1 }
 0x204   :  { %v507_v1 = vmax.f32 %v449_v63, 0.0  ;;  %v3531_v2 = vpop.f32.mrb[79].mxu1 }
 0x206   :  { %v524_v3 = vpack.c.bf16 %v507_v1, %v506_v61 }
 0x208   :  { %3585 = vmatmul.mubr.msk.bf16.gmra.mrb[32].mxu0 %vm86_vm1, %v524_v3 }
 0x209   :  { %v454_v4 = vpop.f32.mrb[80].mxu1  ;;  %3588 = vmatprep.mubr.msk.bf16.mxu0 %vm4199_vm0, %v4198_v0 }
 0x20a   :  { %v508_v5 = vmax.f32 %v454_v4, 0.0  ;;  %v3534_v6 = vpop.f32.mrb[81].mxu1 }
 0x20b   :  { %v457_v7 = vpop.f32.mrb[82].mxu1 }
 0x20c   :  { %v509_v8 = vmax.f32 %v457_v7, 0.0  ;;  %v3535_v9 = vpop.f32.mrb[83].mxu1 }
 0x20e   :  { %v525_v10 = vpack.c.bf16 %v509_v8, %v508_v5 }
 0x210   :  { %3589 = vmatmul.mubr.msk.bf16.gmra.mrb[36].mxu0 %vm86_vm1, %v525_v10 }
 0x211   :  { %v462_v11 = vpop.f32.mrb[84].mxu1  ;;  %3592 = vmatprep.mubr.msk.bf16.mxu0 %vm4199_vm0, %v4198_v0 }
 0x212   :  { %v510_v12 = vmax.f32 %v462_v11, 0.0  ;;  %v3538_v13 = vpop.f32.mrb[85].mxu1 }
 0x213   :  { %v465_v14 = vpop.f32.mrb[86].mxu1 }
 0x214   :  { %v511_v15 = vmax.f32 %v465_v14, 0.0  ;;  %v3539_v16 = vpop.f32.mrb[87].mxu1 }
 0x216   :  { %v526_v17 = vpack.c.bf16 %v511_v15, %v510_v12 }
 0x218   :  { %3593 = vmatmul.mubr.msk.bf16.gmra.mrb[40].mxu0 %vm86_vm1, %v526_v17 }
 0x219   :  { %v470_v18 = vpop.f32.mrb[88].mxu1  ;;  %3596 = vmatprep.mubr.msk.bf16.mxu0 %vm4199_vm0, %v4198_v0 }
 0x21a   :  { %v512_v19 = vmax.f32 %v470_v18, 0.0  ;;  %v3542_v20 = vpop.f32.mrb[89].mxu1 }
 0x21b   :  { %v473_v21 = vpop.f32.mrb[90].mxu1 }
 0x21c   :  { %v513_v22 = vmax.f32 %v473_v21, 0.0  ;;  %v3543_v23 = vpop.f32.mrb[91].mxu1 }
 0x21e   :  { %v527_v24 = vpack.c.bf16 %v513_v22, %v512_v19 }
 0x220   :  { %3597 = vmatmul.mubr.msk.bf16.gmra.mrb[44].mxu0 %vm86_vm1, %v527_v24 }
 0x221   :  { %v478_v25 = vpop.f32.mrb[92].mxu1  ;;  %3600 = vmatprep.mubr.msk.bf16.mxu0 %vm4199_vm0, %v4198_v0 }
 0x222   :  { %v514_v26 = vmax.f32 %v478_v25, 0.0  ;;  %v3546_v27 = vpop.f32.mrb[93].mxu1 }
 0x223   :  { %v481_v28 = vpop.f32.mrb[94].mxu1 }
 0x224   :  { %v515_v29 = vmax.f32 %v481_v28, 0.0  ;;  %v3547_v30 = vpop.f32.mrb[95].mxu1 }
 0x226   :  { %v528_v31 = vpack.c.bf16 %v515_v29, %v514_v26 }
 0x228   :  { %3601 = vmatmul.mubr.msk.bf16.gmra.mrb[48].mxu0 %vm86_vm1, %v528_v31 }
 0x229   :  { %v486_v32 = vpop.f32.mrb[96].mxu1  ;;  %3604 = vmatprep.mubr.msk.bf16.mxu0 %vm4199_vm0, %v4198_v0 }
 0x22a   :  { %v516_v33 = vmax.f32 %v486_v32, 0.0  ;;  %v3550_v34 = vpop.f32.mrb[97].mxu1 }
 0x22b   :  { %v489_v35 = vpop.f32.mrb[98].mxu1 }
 0x22c   :  { %v529_v36 = vpack.c.bf16 %v516_v33, %v516_v33  ;;  %v3551_v37 = vpop.f32.mrb[99].mxu1 }
 0x230   :  { %3605 = vmatmul.mubr.msk.bf16.gmra.mrb[52].mxu0 %vm86_vm1, %v529_v36 }
 0x231   :  { %3668 = vmatprep.mubr.msk.bf16.mxu0 %vm4199_vm0, %v4198_v0 }
 0x2a3   :  { %v620_v40 = vpop.f32.mrb[4].mxu0 }
 0x2a4   :  { %v3558_v41 = vpop.f32.mrb[5].mxu0  ;;  %v722_v43 = vmax.f32 %v620_v40, 0.0 }
 0x2a5   :  { %v623_v42 = vpop.f32.mrb[6].mxu0 }
 0x2a6   :  { %v723_v44 = vmax.f32 %v623_v42, 0.0  ;;  %v3559_v45 = vpop.f32.mrb[7].mxu0 }
 0x2a8   :  { %v747_v46 = vpack.c.bf16 %v723_v44, %v722_v43 }
 0x2aa   :  { %3613 = vmatmul.mubr.msk.bf16.vlgmr.msra.gmra.mrb[100].mxu1 %vm86_vm1, %v747_v46 }
 0x2ab   :  { %v628_v47 = vpop.f32.mrb[8].mxu0  ;;  %3616 = vmatprep.mubr.msk.bf16.mxu1 %vm4199_vm0, %v4198_v0 }
 0x2ac   :  { %v724_v48 = vmax.f32 %v628_v47, 0.0  ;;  %v3562_v49 = vpop.f32.mrb[9].mxu0 }
 0x2ad   :  { %v631_v50 = vpop.f32.mrb[10].mxu0 }
 0x2ae   :  { %v725_v51 = vmax.f32 %v631_v50, 0.0  ;;  %v3563_v52 = vpop.f32.mrb[11].mxu0 }
 0x2b0   :  { %v748_v53 = vpack.c.bf16 %v725_v51, %v724_v48 }
 0x2b2   :  { %3617 = vmatmul.mubr.msk.bf16.gmra.mrb[104].mxu1 %vm86_vm1, %v748_v53 }
 0x2b3   :  { %v636_v54 = vpop.f32.mrb[12].mxu0  ;;  %3620 = vmatprep.mubr.msk.bf16.mxu1 %vm4199_vm0, %v4198_v0 }
 0x2b4   :  { %v726_v55 = vmax.f32 %v636_v54, 0.0  ;;  %v3566_v56 = vpop.f32.mrb[13].mxu0 }
 0x2b5   :  { %v639_v57 = vpop.f32.mrb[14].mxu0 }
 0x2b6   :  { %v727_v58 = vmax.f32 %v639_v57, 0.0  ;;  %v3567_v59 = vpop.f32.mrb[15].mxu0 }
 0x2b8   :  { %v749_v60 = vpack.c.bf16 %v727_v58, %v726_v55 }
 0x2ba   :  { %3621 = vmatmul.mubr.msk.bf16.gmra.mrb[108].mxu1 %vm86_vm1, %v749_v60 }
 0x2bb   :  { %v644_v61 = vpop.f32.mrb[16].mxu0  ;;  %3624 = vmatprep.mubr.msk.bf16.mxu1 %vm4199_vm0, %v4198_v0 }
 0x2bc   :  { %v728_v62 = vmax.f32 %v644_v61, 0.0  ;;  %v3570_v63 = vpop.f32.mrb[17].mxu0 }
 0x2bd   :  { %v647_v1 = vpop.f32.mrb[18].mxu0 }
 0x2be   :  { %v729_v2 = vmax.f32 %v647_v1, 0.0  ;;  %v3571_v3 = vpop.f32.mrb[19].mxu0 }
 0x2c0   :  { %v750_v4 = vpack.c.bf16 %v729_v2, %v728_v62 }
 0x2c2   :  { %3625 = vmatmul.mubr.msk.bf16.gmra.mrb[112].mxu1 %vm86_vm1, %v750_v4  ;;  %v4111_v4 = vld [vmem:[%s4816_s1 + $0x50] sm:$0xff]  }
 0x2c3   :  { %v652_v5 = vpop.f32.mrb[20].mxu0  ;;  %3628 = vmatprep.mubr.msk.bf16.mxu1 %vm4199_vm0, %v4198_v0  ;;  %3721 = vmatpush3.bf16.msra.mxu1 %v4111_v4 }
 0x2c4   :  { %v730_v6 = vmax.f32 %v652_v5, 0.0  ;;  %v3574_v7 = vpop.f32.mrb[21].mxu0  ;;  %3722 = vmatprep.subr.bf16.mxu1 %v4198_v0  ;;  %v4112_v5 = vld [vmem:[%s4816_s1 + $0x58] sm:$0xff]  }
 0x2c5   :  { %v655_v8 = vpop.f32.mrb[22].mxu0 }
 0x2c6   :  { %v731_v9 = vmax.f32 %v655_v8, 0.0  ;;  %v3575_v10 = vpop.f32.mrb[23].mxu0 }
 0x2c7   :  { %3723 = vmatpush3.bf16.msra.mxu1 %v4112_v5 }
 0x2c8   :  { %v751_v11 = vpack.c.bf16 %v731_v9, %v730_v6  ;;  %3976 = vmatprep.subr.bf16.mxu1 %v4198_v0 }
 0x2ca   :  { %3629 = vmatmul.mubr.msk.bf16.gmra.mrb[116].mxu1 %vm86_vm1, %v751_v11 }
 0x2cb   :  { %v660_v12 = vpop.f32.mrb[24].mxu0  ;;  %3632 = vmatprep.mubr.msk.bf16.mxu1 %vm4199_vm0, %v4198_v0 }
 0x2cc   :  { %v732_v13 = vmax.f32 %v660_v12, 0.0  ;;  %v3578_v14 = vpop.f32.mrb[25].mxu0 }
 0x2cd   :  { %v663_v15 = vpop.f32.mrb[26].mxu0 }
 0x2ce   :  { %v733_v16 = vmax.f32 %v663_v15, 0.0  ;;  %v3579_v17 = vpop.f32.mrb[27].mxu0 }
 0x2d0   :  { %v752_v18 = vpack.c.bf16 %v733_v16, %v732_v13 }
 0x2d2   :  { %3633 = vmatmul.mubr.msk.bf16.gmra.mrb[120].mxu1 %vm86_vm1, %v752_v18 }
 0x2d3   :  { %v668_v19 = vpop.f32.mrb[28].mxu0  ;;  %3636 = vmatprep.mubr.msk.bf16.mxu1 %vm4199_vm0, %v4198_v0 }
 0x2d4   :  { %v734_v20 = vmax.f32 %v668_v19, 0.0  ;;  %v3582_v21 = vpop.f32.mrb[29].mxu0 }
 0x2d5   :  { %v671_v22 = vpop.f32.mrb[30].mxu0 }
 0x2d6   :  { %v735_v23 = vmax.f32 %v671_v22, 0.0  ;;  %v3583_v24 = vpop.f32.mrb[31].mxu0 }
 0x2d8   :  { %v753_v25 = vpack.c.bf16 %v735_v23, %v734_v20 }
 0x2da   :  { %3637 = vmatmul.mubr.msk.bf16.gmra.mrb[124].mxu1 %vm86_vm1, %v753_v25 }
 0x2db   :  { %v676_v26 = vpop.f32.mrb[32].mxu0  ;;  %3640 = vmatprep.mubr.msk.bf16.mxu1 %vm4199_vm0, %v4198_v0 }
 0x2dc   :  { %v736_v27 = vmax.f32 %v676_v26, 0.0  ;;  %v3586_v28 = vpop.f32.mrb[33].mxu0 }
 0x2dd   :  { %v679_v29 = vpop.f32.mrb[34].mxu0 }
 0x2de   :  { %v737_v30 = vmax.f32 %v679_v29, 0.0  ;;  %v3587_v31 = vpop.f32.mrb[35].mxu0 }
 0x2e0   :  { %v754_v32 = vpack.c.bf16 %v737_v30, %v736_v27 }
 0x2e2   :  { %3641 = vmatmul.mubr.msk.bf16.gmra.mrb[128].mxu1 %vm86_vm1, %v754_v32 }
 0x2e3   :  { %v684_v33 = vpop.f32.mrb[36].mxu0  ;;  %3644 = vmatprep.mubr.msk.bf16.mxu1 %vm4199_vm0, %v4198_v0 }
 0x2e4   :  { %v738_v34 = vmax.f32 %v684_v33, 0.0  ;;  %v3590_v35 = vpop.f32.mrb[37].mxu0 }
 0x2e5   :  { %v687_v36 = vpop.f32.mrb[38].mxu0 }
 0x2e6   :  { %v739_v37 = vmax.f32 %v687_v36, 0.0  ;;  %v3591_v38 = vpop.f32.mrb[39].mxu0 }
 0x2e8   :  { %v755_v39 = vpack.c.bf16 %v739_v37, %v738_v34 }
 0x2ea   :  { %3645 = vmatmul.mubr.msk.bf16.gmra.mrb[132].mxu1 %vm86_vm1, %v755_v39 }
 0x2eb   :  { %v692_v40 = vpop.f32.mrb[40].mxu0  ;;  %3648 = vmatprep.mubr.msk.bf16.mxu1 %vm4199_vm0, %v4198_v0 }
 0x2ec   :  { %v740_v41 = vmax.f32 %v692_v40, 0.0  ;;  %v3594_v42 = vpop.f32.mrb[41].mxu0 }
 0x2ed   :  { %v695_v43 = vpop.f32.mrb[42].mxu0 }
 0x2ee   :  { %v741_v44 = vmax.f32 %v695_v43, 0.0  ;;  %v3595_v45 = vpop.f32.mrb[43].mxu0 }
 0x2f0   :  { %v756_v46 = vpack.c.bf16 %v741_v44, %v740_v41 }
 0x2f2   :  { %3649 = vmatmul.mubr.msk.bf16.gmra.mrb[136].mxu1 %vm86_vm1, %v756_v46 }
 0x2f3   :  { %v700_v47 = vpop.f32.mrb[44].mxu0  ;;  %3652 = vmatprep.mubr.msk.bf16.mxu1 %vm4199_vm0, %v4198_v0 }
 0x2f4   :  { %v742_v48 = vmax.f32 %v700_v47, 0.0  ;;  %v3598_v49 = vpop.f32.mrb[45].mxu0 }
 0x2f5   :  { %v703_v50 = vpop.f32.mrb[46].mxu0 }
 0x2f6   :  { %v743_v51 = vmax.f32 %v703_v50, 0.0  ;;  %v3599_v52 = vpop.f32.mrb[47].mxu0 }
 0x2f8   :  { %v757_v53 = vpack.c.bf16 %v743_v51, %v742_v48 }
 0x2fa   :  { %3653 = vmatmul.mubr.msk.bf16.gmra.mrb[140].mxu1 %vm86_vm1, %v757_v53 }
 0x2fb   :  { %v708_v54 = vpop.f32.mrb[48].mxu0  ;;  %3656 = vmatprep.mubr.msk.bf16.mxu1 %vm4199_vm0, %v4198_v0 }
 0x2fc   :  { %v744_v55 = vmax.f32 %v708_v54, 0.0  ;;  %v3602_v56 = vpop.f32.mrb[49].mxu0 }
 0x2fd   :  { %v711_v57 = vpop.f32.mrb[50].mxu0 }
 0x2fe   :  { %v745_v58 = vmax.f32 %v711_v57, 0.0  ;;  %v3603_v59 = vpop.f32.mrb[51].mxu0 }
 0x300   :  { %v758_v60 = vpack.c.bf16 %v745_v58, %v744_v55 }
 0x302   :  { %3657 = vmatmul.mubr.msk.bf16.gmra.mrb[144].mxu1 %vm86_vm1, %v758_v60 }
 0x303   :  { %v716_v61 = vpop.f32.mrb[52].mxu0  ;;  %3660 = vmatprep.mubr.msk.bf16.mxu1 %vm4199_vm0, %v4198_v0 }
 0x304   :  { %v746_v62 = vmax.f32 %v716_v61, 0.0  ;;  %v3606_v63 = vpop.f32.mrb[53].mxu0 }
 0x305   :  { %v719_v1 = vpop.f32.mrb[54].mxu0 }
 0x306   :  { %v759_v2 = vpack.c.bf16 %v746_v62, %v746_v62  ;;  %v3607_v3 = vpop.f32.mrb[55].mxu0 }
 0x30a   :  { %3661 = vmatmul.mubr.msk.bf16.gmra.mrb[148].mxu1 %vm86_vm1, %v759_v2 }
 0x30b   :  { %3724 = vmatprep.mubr.msk.bf16.mxu1 %vm4199_vm0, %v4198_v0 }
 0x37d   :  { %v850_v6 = vpop.f32.mrb[100].mxu1 }
 0x37e   :  { %v3614_v7 = vpop.f32.mrb[101].mxu1  ;;  %v952_v9 = vmax.f32 %v850_v6, 0.0 }
 0x37f   :  { %v853_v8 = vpop.f32.mrb[102].mxu1 }
 0x380   :  { %v953_v10 = vmax.f32 %v853_v8, 0.0  ;;  %v3615_v11 = vpop.f32.mrb[103].mxu1 }
 0x382   :  { %v977_v12 = vpack.c.bf16 %v953_v10, %v952_v9 }
 0x384   :  { %3669 = vmatmul.mubr.msk.bf16.vlgmr.msra.gmra.mrb[56].mxu0 %vm86_vm1, %v977_v12 }
 0x385   :  { %v858_v13 = vpop.f32.mrb[104].mxu1  ;;  %3672 = vmatprep.mubr.msk.bf16.mxu0 %vm4199_vm0, %v4198_v0 }
 0x386   :  { %v954_v14 = vmax.f32 %v858_v13, 0.0  ;;  %v3618_v15 = vpop.f32.mrb[105].mxu1 }
 0x387   :  { %v861_v16 = vpop.f32.mrb[106].mxu1 }
 0x388   :  { %v955_v17 = vmax.f32 %v861_v16, 0.0  ;;  %v3619_v18 = vpop.f32.mrb[107].mxu1 }
 0x38a   :  { %v978_v19 = vpack.c.bf16 %v955_v17, %v954_v14 }
 0x38c   :  { %3673 = vmatmul.mubr.msk.bf16.gmra.mrb[60].mxu0 %vm86_vm1, %v978_v19 }
 0x38d   :  { %v866_v20 = vpop.f32.mrb[108].mxu1  ;;  %3676 = vmatprep.mubr.msk.bf16.mxu0 %vm4199_vm0, %v4198_v0 }
 0x38e   :  { %v956_v21 = vmax.f32 %v866_v20, 0.0  ;;  %v3622_v22 = vpop.f32.mrb[109].mxu1 }
 0x38f   :  { %v869_v23 = vpop.f32.mrb[110].mxu1 }
 0x390   :  { %v957_v24 = vmax.f32 %v869_v23, 0.0  ;;  %v3623_v25 = vpop.f32.mrb[111].mxu1 }
 0x392   :  { %v979_v26 = vpack.c.bf16 %v957_v24, %v956_v21 }
 0x394   :  { %3677 = vmatmul.mubr.msk.bf16.gmra.mrb[64].mxu0 %vm86_vm1, %v979_v26 }
 0x395   :  { %v874_v27 = vpop.f32.mrb[112].mxu1  ;;  %3680 = vmatprep.mubr.msk.bf16.mxu0 %vm4199_vm0, %v4198_v0 }
 0x396   :  { %v958_v28 = vmax.f32 %v874_v27, 0.0  ;;  %v3626_v29 = vpop.f32.mrb[113].mxu1 }
 0x397   :  { %v877_v30 = vpop.f32.mrb[114].mxu1 }
 0x398   :  { %v959_v31 = vmax.f32 %v877_v30, 0.0  ;;  %v3627_v32 = vpop.f32.mrb[115].mxu1 }
 0x39a   :  { %v980_v33 = vpack.c.bf16 %v959_v31, %v958_v28 }
 0x39c   :  { %3681 = vmatmul.mubr.msk.bf16.gmra.mrb[68].mxu0 %vm86_vm1, %v980_v33  ;;  %v4113_v33 = vld [vmem:[#allocation2] sm:$0xff]  }
 0x39d   :  { %v882_v34 = vpop.f32.mrb[116].mxu1  ;;  %3684 = vmatprep.mubr.msk.bf16.mxu0 %vm4199_vm0, %v4198_v0  ;;  %3777 = vmatpush3.bf16.msra.mxu0 %v4113_v33 }
 0x39e   :  { %v960_v35 = vmax.f32 %v882_v34, 0.0  ;;  %v3630_v36 = vpop.f32.mrb[117].mxu1  ;;  %3778 = vmatprep.subr.bf16.mxu0 %v4198_v0  ;;  %v4114_v34 = vld [vmem:[#allocation2 + $0x8] sm:$0xff]  }
 0x39f   :  { %v885_v37 = vpop.f32.mrb[118].mxu1 }
 0x3a0   :  { %v961_v38 = vmax.f32 %v885_v37, 0.0  ;;  %v3631_v39 = vpop.f32.mrb[119].mxu1 }
 0x3a1   :  { %3779 = vmatpush3.bf16.msra.mxu0 %v4114_v34 }
 0x3a2   :  { %v981_v40 = vpack.c.bf16 %v961_v38, %v960_v35  ;;  %3784 = vmatprep.subr.bf16.mxu0 %v4198_v0 }
 0x3a4   :  { %3685 = vmatmul.mubr.msk.bf16.gmra.mrb[72].mxu0 %vm86_vm1, %v981_v40 }
 0x3a5   :  { %v890_v41 = vpop.f32.mrb[120].mxu1  ;;  %3688 = vmatprep.mubr.msk.bf16.mxu0 %vm4199_vm0, %v4198_v0 }
 0x3a6   :  { %v962_v42 = vmax.f32 %v890_v41, 0.0  ;;  %v3634_v43 = vpop.f32.mrb[121].mxu1 }
 0x3a7   :  { %v893_v44 = vpop.f32.mrb[122].mxu1 }
 0x3a8   :  { %v963_v45 = vmax.f32 %v893_v44, 0.0  ;;  %v3635_v46 = vpop.f32.mrb[123].mxu1 }
 0x3aa   :  { %v982_v47 = vpack.c.bf16 %v963_v45, %v962_v42 }
 0x3ac   :  { %3689 = vmatmul.mubr.msk.bf16.gmra.mrb[76].mxu0 %vm86_vm1, %v982_v47 }
 0x3ad   :  { %v898_v48 = vpop.f32.mrb[124].mxu1  ;;  %3692 = vmatprep.mubr.msk.bf16.mxu0 %vm4199_vm0, %v4198_v0 }
 0x3ae   :  { %v964_v49 = vmax.f32 %v898_v48, 0.0  ;;  %v3638_v50 = vpop.f32.mrb[125].mxu1 }
 0x3af   :  { %v901_v51 = vpop.f32.mrb[126].mxu1 }
 0x3b0   :  { %v965_v52 = vmax.f32 %v901_v51, 0.0  ;;  %v3639_v53 = vpop.f32.mrb[127].mxu1 }
 0x3b2   :  { %v983_v54 = vpack.c.bf16 %v965_v52, %v964_v49 }
 0x3b4   :  { %3693 = vmatmul.mubr.msk.bf16.gmra.mrb[80].mxu0 %vm86_vm1, %v983_v54 }
 0x3b5   :  { %v906_v55 = vpop.f32.mrb[128].mxu1  ;;  %3696 = vmatprep.mubr.msk.bf16.mxu0 %vm4199_vm0, %v4198_v0 }
 0x3b6   :  { %v966_v56 = vmax.f32 %v906_v55, 0.0  ;;  %v3642_v57 = vpop.f32.mrb[129].mxu1 }
 0x3b7   :  { %v909_v58 = vpop.f32.mrb[130].mxu1 }
 0x3b8   :  { %v967_v59 = vmax.f32 %v909_v58, 0.0  ;;  %v3643_v60 = vpop.f32.mrb[131].mxu1 }
 0x3ba   :  { %v984_v61 = vpack.c.bf16 %v967_v59, %v966_v56 }
 0x3bc   :  { %3697 = vmatmul.mubr.msk.bf16.gmra.mrb[84].mxu0 %vm86_vm1, %v984_v61 }
 0x3bd   :  { %v914_v62 = vpop.f32.mrb[132].mxu1  ;;  %3700 = vmatprep.mubr.msk.bf16.mxu0 %vm4199_vm0, %v4198_v0 }
 0x3be   :  { %v968_v63 = vmax.f32 %v914_v62, 0.0  ;;  %v3646_v1 = vpop.f32.mrb[133].mxu1 }
 0x3bf   :  { %v917_v2 = vpop.f32.mrb[134].mxu1 }
 0x3c0   :  { %v969_v3 = vmax.f32 %v917_v2, 0.0  ;;  %v3647_v4 = vpop.f32.mrb[135].mxu1 }
 0x3c2   :  { %v985_v5 = vpack.c.bf16 %v969_v3, %v968_v63 }
 0x3c4   :  { %3701 = vmatmul.mubr.msk.bf16.gmra.mrb[88].mxu0 %vm86_vm1, %v985_v5 }
 0x3c5   :  { %v922_v6 = vpop.f32.mrb[136].mxu1  ;;  %3704 = vmatprep.mubr.msk.bf16.mxu0 %vm4199_vm0, %v4198_v0 }
 0x3c6   :  { %v970_v7 = vmax.f32 %v922_v6, 0.0  ;;  %v3650_v8 = vpop.f32.mrb[137].mxu1 }
 0x3c7   :  { %v925_v9 = vpop.f32.mrb[138].mxu1 }
 0x3c8   :  { %v971_v10 = vmax.f32 %v925_v9, 0.0  ;;  %v3651_v11 = vpop.f32.mrb[139].mxu1 }
 0x3ca   :  { %v986_v12 = vpack.c.bf16 %v971_v10, %v970_v7 }
 0x3cc   :  { %3705 = vmatmul.mubr.msk.bf16.gmra.mrb[92].mxu0 %vm86_vm1, %v986_v12 }
 0x3cd   :  { %v930_v13 = vpop.f32.mrb[140].mxu1  ;;  %3708 = vmatprep.mubr.msk.bf16.mxu0 %vm4199_vm0, %v4198_v0 }
 0x3ce   :  { %v972_v14 = vmax.f32 %v930_v13, 0.0  ;;  %v3654_v15 = vpop.f32.mrb[141].mxu1 }
 0x3cf   :  { %v933_v16 = vpop.f32.mrb[142].mxu1 }
 0x3d0   :  { %v973_v17 = vmax.f32 %v933_v16, 0.0  ;;  %v3655_v18 = vpop.f32.mrb[143].mxu1 }
 0x3d2   :  { %v987_v19 = vpack.c.bf16 %v973_v17, %v972_v14 }
 0x3d4   :  { %3709 = vmatmul.mubr.msk.bf16.gmra.mrb[96].mxu0 %vm86_vm1, %v987_v19 }
 0x3d5   :  { %v938_v20 = vpop.f32.mrb[144].mxu1  ;;  %3712 = vmatprep.mubr.msk.bf16.mxu0 %vm4199_vm0, %v4198_v0 }
 0x3d6   :  { %v974_v21 = vmax.f32 %v938_v20, 0.0  ;;  %v3658_v22 = vpop.f32.mrb[145].mxu1 }
 0x3d7   :  { %v941_v23 = vpop.f32.mrb[146].mxu1 }
 0x3d8   :  { %v975_v24 = vmax.f32 %v941_v23, 0.0  ;;  %v3659_v25 = vpop.f32.mrb[147].mxu1 }
 0x3da   :  { %v988_v26 = vpack.c.bf16 %v975_v24, %v974_v21 }
 0x3dc   :  { %3713 = vmatmul.mubr.msk.bf16.gmra.mrb[100].mxu0 %vm86_vm1, %v988_v26 }
 0x3dd   :  { %v946_v27 = vpop.f32.mrb[148].mxu1  ;;  %3716 = vmatprep.mubr.msk.bf16.mxu0 %vm4199_vm0, %v4198_v0 }
 0x3de   :  { %v976_v28 = vmax.f32 %v946_v27, 0.0  ;;  %v3662_v29 = vpop.f32.mrb[149].mxu1 }
 0x3df   :  { %v949_v30 = vpop.f32.mrb[150].mxu1 }
 0x3e0   :  { %v989_v31 = vpack.c.bf16 %v976_v28, %v976_v28  ;;  %v3663_v32 = vpop.f32.mrb[151].mxu1 }
 0x3e4   :  { %3717 = vmatmul.mubr.msk.bf16.gmra.mrb[104].mxu0 %vm86_vm1, %v989_v31 }
 0x3e5   :  { %3780 = vmatprep.mubr.msk.bf16.mxu0 %vm4199_vm0, %v4198_v0 }
 0x457   :  { %v1080_v35 = vpop.f32.mrb[56].mxu0 }
 0x458   :  { %v3670_v36 = vpop.f32.mrb[57].mxu0  ;;  %v1182_v38 = vmax.f32 %v1080_v35, 0.0 }
 0x459   :  { %v1083_v37 = vpop.f32.mrb[58].mxu0 }
 0x45a   :  { %v1183_v39 = vmax.f32 %v1083_v37, 0.0  ;;  %v3671_v40 = vpop.f32.mrb[59].mxu0 }
 0x45c   :  { %v1207_v41 = vpack.c.bf16 %v1183_v39, %v1182_v38 }
 0x45e   :  { %3725 = vmatmul.mubr.msk.bf16.vlgmr.msra.gmra.mrb[152].mxu1 %vm86_vm1, %v1207_v41 }
 0x45f   :  { %v1088_v42 = vpop.f32.mrb[60].mxu0  ;;  %3728 = vmatprep.mubr.msk.bf16.mxu1 %vm4199_vm0, %v4198_v0 }
 0x460   :  { %v1184_v43 = vmax.f32 %v1088_v42, 0.0  ;;  %v3674_v44 = vpop.f32.mrb[61].mxu0 }
 0x461   :  { %v1091_v45 = vpop.f32.mrb[62].mxu0 }
 0x462   :  { %v1185_v46 = vmax.f32 %v1091_v45, 0.0  ;;  %v3675_v47 = vpop.f32.mrb[63].mxu0 }
 0x464   :  { %v1208_v48 = vpack.c.bf16 %v1185_v46, %v1184_v43 }
 0x466   :  { %3729 = vmatmul.mubr.msk.bf16.gmra.mrb[156].mxu1 %vm86_vm1, %v1208_v48 }
 0x467   :  { %v1096_v49 = vpop.f32.mrb[64].mxu0  ;;  %3732 = vmatprep.mubr.msk.bf16.mxu1 %vm4199_vm0, %v4198_v0 }
 0x468   :  { %v1186_v50 = vmax.f32 %v1096_v49, 0.0  ;;  %v3678_v51 = vpop.f32.mrb[65].mxu0 }
 0x469   :  { %v1099_v52 = vpop.f32.mrb[66].mxu0 }
 0x46a   :  { %v1187_v53 = vmax.f32 %v1099_v52, 0.0  ;;  %v3679_v54 = vpop.f32.mrb[67].mxu0 }
 0x46c   :  { %v1209_v55 = vpack.c.bf16 %v1187_v53, %v1186_v50 }
 0x46e   :  { %3733 = vmatmul.mubr.msk.bf16.gmra.mrb[160].mxu1 %vm86_vm1, %v1209_v55 }
 0x46f   :  { %v1104_v56 = vpop.f32.mrb[68].mxu0  ;;  %3736 = vmatprep.mubr.msk.bf16.mxu1 %vm4199_vm0, %v4198_v0 }
 0x470   :  { %v1188_v57 = vmax.f32 %v1104_v56, 0.0  ;;  %v3682_v58 = vpop.f32.mrb[69].mxu0 }
 0x471   :  { %v1107_v59 = vpop.f32.mrb[70].mxu0 }
 0x472   :  { %v1189_v60 = vmax.f32 %v1107_v59, 0.0  ;;  %v3683_v61 = vpop.f32.mrb[71].mxu0 }
 0x474   :  { %v1210_v62 = vpack.c.bf16 %v1189_v60, %v1188_v57 }
 0x476   :  { %3737 = vmatmul.mubr.msk.bf16.gmra.mrb[164].mxu1 %vm86_vm1, %v1210_v62 }
 0x477   :  { %v1112_v63 = vpop.f32.mrb[72].mxu0  ;;  %3740 = vmatprep.mubr.msk.bf16.mxu1 %vm4199_vm0, %v4198_v0 }
 0x478   :  { %v1190_v1 = vmax.f32 %v1112_v63, 0.0  ;;  %v3686_v2 = vpop.f32.mrb[73].mxu0 }
 0x479   :  { %v1115_v3 = vpop.f32.mrb[74].mxu0 }
 0x47a   :  { %v1191_v4 = vmax.f32 %v1115_v3, 0.0  ;;  %v3687_v5 = vpop.f32.mrb[75].mxu0  ;;  %v4115_v3 = vld [vmem:[#allocation2 + $0x10] sm:$0xff]  }
 0x47c   :  { %v1211_v6 = vpack.c.bf16 %v1191_v4, %v1190_v1 }
 0x47e   :  { %3741 = vmatmul.mubr.msk.bf16.gmra.mrb[168].mxu1 %vm86_vm1, %v1211_v6  ;;  %v4116_v6 = vld [vmem:[#allocation2 + $0x18] sm:$0xff]  }
 0x47f   :  { %v1120_v7 = vpop.f32.mrb[76].mxu0  ;;  %3744 = vmatprep.mubr.msk.bf16.mxu1 %vm4199_vm0, %v4198_v0 }
 0x480   :  { %v1192_v8 = vmax.f32 %v1120_v7, 0.0  ;;  %v3690_v9 = vpop.f32.mrb[77].mxu0 }
 0x481   :  { %v1123_v10 = vpop.f32.mrb[78].mxu0 }
 0x482   :  { %v1193_v11 = vmax.f32 %v1123_v10, 0.0  ;;  %v3691_v12 = vpop.f32.mrb[79].mxu0 }
 0x483   :  { %v4117_v12 = vld [vmem:[#allocation2 + $0x20] sm:$0xff]  }
 0x484   :  { %v1212_v13 = vpack.c.bf16 %v1193_v11, %v1192_v8 }
 0x486   :  { %3745 = vmatmul.mubr.msk.bf16.gmra.mrb[172].mxu1 %vm86_vm1, %v1212_v13 }
 0x487   :  { %v1128_v14 = vpop.f32.mrb[80].mxu0  ;;  %3748 = vmatprep.mubr.msk.bf16.mxu1 %vm4199_vm0, %v4198_v0 }
 0x488   :  { %v1194_v15 = vmax.f32 %v1128_v14, 0.0  ;;  %v3694_v16 = vpop.f32.mrb[81].mxu0 }
 0x489   :  { %v1131_v17 = vpop.f32.mrb[82].mxu0  ;;  %v4118_v16 = vld [vmem:[#allocation2 + $0x28] sm:$0xff]  }
 0x48a   :  { %v1195_v18 = vmax.f32 %v1131_v17, 0.0  ;;  %v3695_v19 = vpop.f32.mrb[83].mxu0 }
 0x48c   :  { %v1213_v20 = vpack.c.bf16 %v1195_v18, %v1194_v15 }
 0x48e   :  { %3749 = vmatmul.mubr.msk.bf16.gmra.mrb[176].mxu1 %vm86_vm1, %v1213_v20 }
 0x48f   :  { %v1136_v21 = vpop.f32.mrb[84].mxu0  ;;  %3752 = vmatprep.mubr.msk.bf16.mxu1 %vm4199_vm0, %v4198_v0 }
 0x490   :  { %v1196_v22 = vmax.f32 %v1136_v21, 0.0  ;;  %v3698_v23 = vpop.f32.mrb[85].mxu0 }
 0x491   :  { %v1139_v24 = vpop.f32.mrb[86].mxu0 }
 0x492   :  { %v1197_v25 = vmax.f32 %v1139_v24, 0.0  ;;  %v3699_v26 = vpop.f32.mrb[87].mxu0 }
 0x493   :  { %v4120_v26 = vld [vmem:[#allocation2 + $0x38] sm:$0xff]  }
 0x494   :  { %v1214_v27 = vpack.c.bf16 %v1197_v25, %v1196_v22  ;;  %v4119_v22 = vld [vmem:[#allocation2 + $0x30] sm:$0xff]  }
 0x496   :  { %3753 = vmatmul.mubr.msk.bf16.gmra.mrb[180].mxu1 %vm86_vm1, %v1214_v27 }
 0x497   :  { %v1144_v28 = vpop.f32.mrb[88].mxu0  ;;  %3756 = vmatprep.mubr.msk.bf16.mxu1 %vm4199_vm0, %v4198_v0 }
 0x498   :  { %v1198_v29 = vmax.f32 %v1144_v28, 0.0  ;;  %v3702_v30 = vpop.f32.mrb[89].mxu0 }
 0x499   :  { %v1147_v31 = vpop.f32.mrb[90].mxu0 }
 0x49a   :  { %v1199_v32 = vmax.f32 %v1147_v31, 0.0  ;;  %v3703_v33 = vpop.f32.mrb[91].mxu0 }
 0x49c   :  { %v1215_v34 = vpack.c.bf16 %v1199_v32, %v1198_v29  ;;  %v4121_v32 = vld [vmem:[#allocation2 + $0x40] sm:$0xff]  }
 0x49e   :  { %3757 = vmatmul.mubr.msk.bf16.gmra.mrb[184].mxu1 %vm86_vm1, %v1215_v34 }
 0x49f   :  { %v1152_v35 = vpop.f32.mrb[92].mxu0  ;;  %3760 = vmatprep.mubr.msk.bf16.mxu1 %vm4199_vm0, %v4198_v0 }
 0x4a0   :  { %v1200_v36 = vmax.f32 %v1152_v35, 0.0  ;;  %v3706_v37 = vpop.f32.mrb[93].mxu0 }
 0x4a1   :  { %v1155_v38 = vpop.f32.mrb[94].mxu0 }
 0x4a2   :  { %v1201_v39 = vmax.f32 %v1155_v38, 0.0  ;;  %v3707_v40 = vpop.f32.mrb[95].mxu0 }
 0x4a4   :  { %v1216_v41 = vpack.c.bf16 %v1201_v39, %v1200_v36  ;;  %v4122_v36 = vld [vmem:[#allocation2 + $0x48] sm:$0xff]  }
 0x4a6   :  { %3761 = vmatmul.mubr.msk.bf16.gmra.mrb[188].mxu1 %vm86_vm1, %v1216_v41 }
 0x4a7   :  { %v1160_v42 = vpop.f32.mrb[96].mxu0  ;;  %3764 = vmatprep.mubr.msk.bf16.mxu1 %vm4199_vm0, %v4198_v0 }
 0x4a8   :  { %v1202_v43 = vmax.f32 %v1160_v42, 0.0  ;;  %v3710_v44 = vpop.f32.mrb[97].mxu0  ;;  %v4123_v42 = vld [vmem:[#allocation2 + $0x50] sm:$0xff]  }
 0x4a9   :  { %v1163_v45 = vpop.f32.mrb[98].mxu0 }
 0x4aa   :  { %v1203_v46 = vmax.f32 %v1163_v45, 0.0  ;;  %v3711_v47 = vpop.f32.mrb[99].mxu0 }
 0x4ac   :  { %v1217_v48 = vpack.c.bf16 %v1203_v46, %v1202_v43  ;;  %v4124_v46 = vld [vmem:[#allocation2 + $0x58] sm:$0xff]  }
 0x4ae   :  { %3765 = vmatmul.mubr.msk.bf16.gmra.mrb[192].mxu1 %vm86_vm1, %v1217_v48 }
 0x4af   :  { %v1168_v49 = vpop.f32.mrb[100].mxu0  ;;  %3768 = vmatprep.mubr.msk.bf16.mxu1 %vm4199_vm0, %v4198_v0 }
 0x4b0   :  { %v1204_v50 = vmax.f32 %v1168_v49, 0.0  ;;  %v3714_v51 = vpop.f32.mrb[101].mxu0 }
 0x4b1   :  { %v1171_v52 = vpop.f32.mrb[102].mxu0 }
 0x4b2   :  { %v1205_v53 = vmax.f32 %v1171_v52, 0.0  ;;  %v3715_v54 = vpop.f32.mrb[103].mxu0  ;;  %v4125_v52 = vld [vmem:[#allocation2 + $0x60] sm:$0xff]  }
 0x4b4   :  { %v1218_v55 = vpack.c.bf16 %v1205_v53, %v1204_v50 }
 0x4b6   :  { %3769 = vmatmul.mubr.msk.bf16.gmra.mrb[196].mxu1 %vm86_vm1, %v1218_v55 }
 0x4b7   :  { %v1176_v56 = vpop.f32.mrb[104].mxu0  ;;  %3772 = vmatprep.mubr.msk.bf16.mxu1 %vm4199_vm0, %v4198_v0 }
 0x4b8   :  { %v1206_v57 = vmax.f32 %v1176_v56, 0.0  ;;  %v3718_v58 = vpop.f32.mrb[105].mxu0  ;;  %v4126_v56 = vld [vmem:[#allocation2 + $0x68] sm:$0xff]  }
 0x4b9   :  { %v1179_v59 = vpop.f32.mrb[106].mxu0 }
 0x4ba   :  { %v1219_v60 = vpack.c.bf16 %v1206_v57, %v1206_v57  ;;  %v3719_v61 = vpop.f32.mrb[107].mxu0 }
 0x4be   :  { %3773 = vmatmul.mubr.msk.bf16.gmra.mrb[200].mxu1 %vm86_vm1, %v1219_v60 }
 0x4bf   :  { %3992 = vmatprep.mubr.msk.bf16.mxu1 %vm4199_vm0, %v4198_v0 }
 0x531   :  { %v1310_v62 = vpop.f32.mrb[152].mxu1 }
 0x532   :  { %v1412_v63 = vmax.f32 %v1310_v62, 0.0  ;;  %v3726_v1 = vpop.f32.mrb[153].mxu1  ;;  %v4127_v62 = vld [vmem:[#allocation2 + $0x70] sm:$0xff]  }
 0x533   :  { %v1313_v2 = vpop.f32.mrb[154].mxu1 }
 0x534   :  { %v1437_v4 = vpack.c.bf16 %v1412_v63, %v1412_v63  ;;  %v3727_v5 = vpop.f32.mrb[155].mxu1  ;;  %v1413_v10 = vmax.f32 %v1313_v2, 0.0 }
 0x536   :  { %3781 = vmatmul.mubr.msk.bf16.vlgmr.msra.gmra.mrb[108].mxu0 %vm86_vm1, %v1437_v4  ;;  %v1438_v13 = vpack.c.bf16 %v1413_v10, %v1413_v10 }
 0x537   :  { %3785 = vmatpush3.bf16.msra.mxu0 %v4115_v3  ;;  %3788 = vmatprep.mubr.msk.bf16.mxu0 %vm4199_vm0, %v4198_v0  ;;  %v4128_v3 = vld [vmem:[#allocation2 + $0x78] sm:$0xff]  }
 0x538   :  { %3786 = vmatprep.subr.bf16.mxu0 %v4198_v0 }
 0x539   :  { %v1318_v7 = vpop.f32.mrb[156].mxu1 }
 0x53a   :  { %v3730_v8 = vpop.f32.mrb[157].mxu1  ;;  %v1414_v19 = vmax.f32 %v1318_v7, 0.0 }
 0x53b   :  { %3787 = vmatpush3.bf16.msra.mxu0 %v4116_v6  ;;  %v1321_v9 = vpop.f32.mrb[158].mxu1 }
 0x53c   :  { %v3731_v11 = vpop.f32.mrb[159].mxu1  ;;  %3792 = vmatprep.subr.bf16.mxu0 %v4198_v0  ;;  %v1439_v24 = vpack.c.bf16 %v1414_v19, %v1414_v19  ;;  %v1415_v30 = vmax.f32 %v1321_v9, 0.0  ;;  %v4129_v9 = vld [vmem:[#allocation2 + $0x80] sm:$0xff]   ;;  %v4131_v19 = vld [vmem:[#allocation2 + $0x90] sm:$0xff]  }
 0x53e   :  { %v1440_v33 = vpack.c.bf16 %v1415_v30, %v1415_v30  ;;  %v4135_v30 = vld [vmem:[#allocation2 + $0xb0] sm:$0xff]  }
 0x541   :  { %v1326_v14 = vpop.f32.mrb[160].mxu1 }
 0x542   :  { %3789 = vmatmul.mubr.msk.bf16.vlgmr.msra.gmra.mrb[108].mxu0 %vm86_vm1, %v1438_v13  ;;  %v3734_v15 = vpop.f32.mrb[161].mxu1  ;;  %v1416_v39 = vmax.f32 %v1326_v14, 0.0  ;;  %v4130_v13 = vld [vmem:[#allocation2 + $0x88] sm:$0xff]  }
 0x543   :  { %3793 = vmatpush3.bf16.msra.mxu0 %v4117_v12  ;;  %3796 = vmatprep.mubr.msk.bf16.mxu0 %vm4199_vm0, %v4198_v0  ;;  %v1329_v17 = vpop.f32.mrb[162].mxu1 }
 0x544   :  { %3794 = vmatprep.subr.bf16.mxu0 %v4198_v0  ;;  %v3735_v18 = vpop.f32.mrb[163].mxu1  ;;  %v1441_v44 = vpack.c.bf16 %v1416_v39, %v1416_v39  ;;  %v1417_v50 = vmax.f32 %v1329_v17, 0.0  ;;  %v4140_v39 = vld [vmem:[#allocation2 + $0xd8] sm:$0xff]  }
 0x546   :  { %v1442_v53 = vpack.c.bf16 %v1417_v50, %v1417_v50 }
 0x547   :  { %3795 = vmatpush3.bf16.msra.mxu0 %v4118_v16 }
 0x548   :  { %3800 = vmatprep.subr.bf16.mxu0 %v4198_v0 }
 0x549   :  { %v4614_v20 = vpop.f32.mrb[164].mxu1 }
 0x54a   :  { %v3738_v21 = vpop.f32.mrb[165].mxu1  ;;  %v1418_v59 = vmax.f32 %v4614_v20, 0.0 }
 0x54b   :  { %v4616_v23 = vpop.f32.mrb[166].mxu1 }
 0x54c   :  { %v3739_v25 = vpop.f32.mrb[167].mxu1  ;;  %v1443_v1 = vpack.c.bf16 %v1418_v59, %v1418_v59  ;;  %v1419_v7 = vmax.f32 %v4616_v23, 0.0  ;;  %v4132_v23 = vld [vmem:[#allocation2 + $0x98] sm:$0xff]   ;;  %v4168_v59 = vld [vmem:[%s4818_s3 + $0x28] sm:$0xff]  }
 0x54d   :  { %v4133_v25 = vld [vmem:[#allocation2 + $0xa0] sm:$0xff]  }
 0x54e   :  { %3797 = vmatmul.mubr.msk.bf16.vlgmr.msra.gmra.mrb[108].mxu0 %vm86_vm1, %v1439_v24  ;;  %v1444_v10 = vpack.c.bf16 %v1419_v7, %v1419_v7  ;;  %v4149_v7 = vld [vmem:[#allocation2 + $0x120] sm:$0xff]  }
 0x54f   :  { %3801 = vmatpush3.bf16.msra.mxu0 %v4119_v22  ;;  %3804 = vmatprep.mubr.msk.bf16.mxu0 %vm4199_vm0, %v4198_v0 }
 0x550   :  { %3802 = vmatprep.subr.bf16.mxu0 %v4198_v0 }
 0x551   :  { %v4622_v27 = vpop.f32.mrb[168].mxu1 }
 0x552   :  { %v3742_v28 = vpop.f32.mrb[169].mxu1  ;;  %v1420_v16 = vmax.f32 %v4622_v27, 0.0  ;;  %v4134_v27 = vld [vmem:[#allocation2 + $0xa8] sm:$0xff]  }
 0x553   :  { %3803 = vmatpush3.bf16.msra.mxu0 %v4120_v26  ;;  %v4624_v29 = vpop.f32.mrb[170].mxu1 }
 0x554   :  { %3808 = vmatprep.subr.bf16.mxu0 %v4198_v0  ;;  %v3743_v31 = vpop.f32.mrb[171].mxu1  ;;  %v1445_v21 = vpack.c.bf16 %v1420_v16, %v1420_v16  ;;  %v1421_v24 = vmax.f32 %v4624_v29, 0.0  ;;  %v4153_v16 = vld [vmem:[#allocation2 + $0x140] sm:$0xff]  }
 0x555   :  { %v4136_v31 = vld [vmem:[#allocation2 + $0xb8] sm:$0xff]  }
 0x556   :  { %v1446_v26 = vpack.c.bf16 %v1421_v24, %v1421_v24  ;;  %v4158_v24 = vld [vmem:[#allocation2 + $0x168] sm:$0xff]  }
 0x559   :  { %v4627_v34 = vpop.f32.mrb[172].mxu1 }
 0x55a   :  { %3805 = vmatmul.mubr.msk.bf16.vlgmr.msra.gmra.mrb[108].mxu0 %vm86_vm1, %v1440_v33  ;;  %v3746_v35 = vpop.f32.mrb[173].mxu1  ;;  %v1422_v28 = vmax.f32 %v4627_v34, 0.0  ;;  %v4137_v33 = vld [vmem:[#allocation2 + $0xc0] sm:$0xff]  }
 0x55b   :  { %3809 = vmatpush3.bf16.msra.mxu0 %v4121_v32  ;;  %3812 = vmatprep.mubr.msk.bf16.mxu0 %vm4199_vm0, %v4198_v0  ;;  %v4632_v37 = vpop.f32.mrb[174].mxu1  ;;  %v4138_v35 = vld [vmem:[#allocation2 + $0xc8] sm:$0xff]  }
 0x55c   :  { %3810 = vmatprep.subr.bf16.mxu0 %v4198_v0  ;;  %v3747_v38 = vpop.f32.mrb[175].mxu1  ;;  %v1447_v29 = vpack.c.bf16 %v1422_v28, %v1422_v28  ;;  %v1423_v32 = vmax.f32 %v4632_v37, 0.0 }
 0x55d   :  { %v4139_v38 = vld [vmem:[#allocation2 + $0xd0] sm:$0xff]  }
 0x55e   :  { %v1448_v34 = vpack.c.bf16 %v1423_v32, %v1423_v32 }
 0x55f   :  { %3811 = vmatpush3.bf16.msra.mxu0 %v4122_v36 }
 0x560   :  { %3816 = vmatprep.subr.bf16.mxu0 %v4198_v0 }
 0x561   :  { %v4636_v40 = vpop.f32.mrb[176].mxu1 }
 0x562   :  { %v3750_v41 = vpop.f32.mrb[177].mxu1  ;;  %v1424_v36 = vmax.f32 %v4636_v40, 0.0 }
 0x563   :  { %v4638_v43 = vpop.f32.mrb[178].mxu1 }
 0x564   :  { %v3751_v45 = vpop.f32.mrb[179].mxu1  ;;  %v1449_v37 = vpack.c.bf16 %v1424_v36, %v1424_v36  ;;  %v1425_v41 = vmax.f32 %v4638_v43, 0.0 }
 0x565   :  { %v4163_v45 = vld [vmem:[%s4818_s3] sm:$0xff]  }
 0x566   :  { %3813 = vmatmul.mubr.msk.bf16.vlgmr.msra.gmra.mrb[108].mxu0 %vm86_vm1, %v1441_v44  ;;  %v1450_v40 = vpack.c.bf16 %v1425_v41, %v1425_v41  ;;  %v4142_v44 = vld [vmem:[#allocation2 + $0xe8] sm:$0xff]   ;;  %3977 = vmatpush3.bf16.msra.mxu1 %v4163_v45 }
 0x567   :  { %3817 = vmatpush3.bf16.msra.mxu0 %v4123_v42  ;;  %3820 = vmatprep.mubr.msk.bf16.mxu0 %vm4199_vm0, %v4198_v0  ;;  %v4141_v42 = vld [vmem:[#allocation2 + $0xe0] sm:$0xff]  }
 0x568   :  { %3818 = vmatprep.subr.bf16.mxu0 %v4198_v0  ;;  %3978 = vmatprep.subr.bf16.mxu1 %v4198_v0 }
 0x569   :  { %v4644_v47 = vpop.f32.mrb[180].mxu1 }
 0x56a   :  { %v3754_v48 = vpop.f32.mrb[181].mxu1  ;;  %v1426_v43 = vmax.f32 %v4644_v47, 0.0  ;;  %v4144_v47 = vld [vmem:[#allocation2 + $0xf8] sm:$0xff]  }
 0x56b   :  { %3819 = vmatpush3.bf16.msra.mxu0 %v4124_v46  ;;  %v4646_v49 = vpop.f32.mrb[182].mxu1  ;;  %v4164_v46 = vld [vmem:[%s4818_s3 + $0x8] sm:$0xff]   ;;  %v4143_v48 = vld [vmem:[#allocation2 + $0xf0] sm:$0xff]  }
 0x56c   :  { %3824 = vmatprep.subr.bf16.mxu0 %v4198_v0  ;;  %v3755_v51 = vpop.f32.mrb[183].mxu1  ;;  %v1451_v50 = vpack.c.bf16 %v1426_v43, %v1426_v43  ;;  %3979 = vmatpush3.bf16.msra.mxu1 %v4164_v46 }
 0x56d   :  { %v4165_v51 = vld [vmem:[%s4818_s3 + $0x10] sm:$0xff]   ;;  %3980 = vmatprep.subr.bf16.mxu1 %v4198_v0 }
 0x570   :  { %3981 = vmatpush3.bf16.msra.mxu1 %v4165_v51 }
 0x571   :  { %v4649_v54 = vpop.f32.mrb[184].mxu1  ;;  %3982 = vmatprep.subr.bf16.mxu1 %v4198_v0 }
 0x572   :  { %3821 = vmatmul.mubr.msk.bf16.vlgmr.msra.gmra.mrb[108].mxu0 %vm86_vm1, %v1442_v53  ;;  %v3758_v55 = vpop.f32.mrb[185].mxu1  ;;  %v1427_v53 = vmax.f32 %v4646_v49, 0.0  ;;  %v4146_v49 = vld [vmem:[#allocation2 + $0x108] sm:$0xff]  }
 0x573   :  { %3825 = vmatpush3.bf16.msra.mxu0 %v4125_v52  ;;  %3828 = vmatprep.mubr.msk.bf16.mxu0 %vm4199_vm0, %v4198_v0  ;;  %v4654_v57 = vpop.f32.mrb[186].mxu1  ;;  %v4166_v52 = vld [vmem:[%s4818_s3 + $0x18] sm:$0xff]   ;;  %v4167_v55 = vld [vmem:[%s4818_s3 + $0x20] sm:$0xff]  }
 0x574   :  { %3826 = vmatprep.subr.bf16.mxu0 %v4198_v0  ;;  %v3759_v58 = vpop.f32.mrb[187].mxu1  ;;  %3983 = vmatpush3.bf16.msra.mxu1 %v4166_v52 }
 0x575   :  { %3984 = vmatprep.subr.bf16.mxu1 %v4198_v0  ;;  %v1452_v58 = vpack.c.bf16 %v1427_v53, %v1427_v53 }
 0x577   :  { %3827 = vmatpush3.bf16.msra.mxu0 %v4126_v56  ;;  %v4145_v56 = vld [vmem:[#allocation2 + $0x100] sm:$0xff]  }
 0x578   :  { %3832 = vmatprep.subr.bf16.mxu0 %v4198_v0  ;;  %3985 = vmatpush3.bf16.msra.mxu1 %v4167_v55 }
 0x579   :  { %v4659_v60 = vpop.f32.mrb[188].mxu1  ;;  %3986 = vmatprep.subr.bf16.mxu1 %v4198_v0 }
 0x57a   :  { %v3762_v61 = vpop.f32.mrb[189].mxu1 }
 0x57b   :  { %v4661_v63 = vpop.f32.mrb[190].mxu1  ;;  %v4169_v61 = vld [vmem:[%s4818_s3 + $0x30] sm:$0xff]  }
 0x57c   :  { %v3763_v2 = vpop.f32.mrb[191].mxu1  ;;  %3987 = vmatpush3.bf16.msra.mxu1 %v4168_v59 }
 0x57d   :  { %3988 = vmatprep.subr.bf16.mxu1 %v4198_v0  ;;  %v4147_v2 = vld [vmem:[#allocation2 + $0x110] sm:$0xff]  }
 0x57e   :  { %3829 = vmatmul.mubr.msk.bf16.vlgmr.msra.gmra.mrb[108].mxu0 %vm86_vm1, %v1443_v1  ;;  %v4170_v1 = vld [vmem:[%s4818_s3 + $0x38] sm:$0xff]  }
 0x57f   :  { %3833 = vmatpush3.bf16.msra.mxu0 %v4127_v62  ;;  %3836 = vmatprep.mubr.msk.bf16.mxu0 %vm4199_vm0, %v4198_v0  ;;  %v1428_v62 = vmax.f32 %v4649_v54, 0.0  ;;  %v1429_v54 = vmax.f32 %v4654_v57, 0.0 }
 0x580   :  { %3834 = vmatprep.subr.bf16.mxu0 %v4198_v0  ;;  %3989 = vmatpush3.bf16.msra.mxu1 %v4169_v61 }
 0x581   :  { %v4667_v4 = vpop.f32.mrb[192].mxu1  ;;  %3990 = vmatprep.subr.bf16.mxu1 %v4198_v0 }
 0x582   :  { %v3766_v5 = vpop.f32.mrb[193].mxu1 }
 0x583   :  { %3835 = vmatpush3.bf16.msra.mxu0 %v4128_v3  ;;  %v4669_v6 = vpop.f32.mrb[194].mxu1  ;;  %v1453_v3 = vpack.c.bf16 %v1428_v62, %v1428_v62  ;;  %v4148_v5 = vld [vmem:[#allocation2 + $0x118] sm:$0xff]  }
 0x584   :  { %3840 = vmatprep.subr.bf16.mxu0 %v4198_v0  ;;  %v3767_v8 = vpop.f32.mrb[195].mxu1  ;;  %3991 = vmatpush3.bf16.msra.mxu1 %v4170_v1 }
 0x585   :  { %v1454_v8 = vpack.c.bf16 %v1429_v54, %v1429_v54 }
 0x589   :  { %v4673_v11 = vpop.f32.mrb[196].mxu1 }
 0x58a   :  { %3837 = vmatmul.mubr.msk.bf16.vlgmr.msra.gmra.mrb[108].mxu0 %vm86_vm1, %v1444_v10  ;;  %v3770_v12 = vpop.f32.mrb[197].mxu1  ;;  %v1430_v10 = vmax.f32 %v4659_v60, 0.0 }
 0x58b   :  { %3841 = vmatpush3.bf16.msra.mxu0 %v4129_v9  ;;  %3844 = vmatprep.mubr.msk.bf16.mxu0 %vm4199_vm0, %v4198_v0  ;;  %v4678_v14 = vpop.f32.mrb[198].mxu1  ;;  %v4150_v9 = vld [vmem:[#allocation2 + $0x128] sm:$0xff]   ;;  %v4151_v12 = vld [vmem:[#allocation2 + $0x130] sm:$0xff]  }
 0x58c   :  { %3842 = vmatprep.subr.bf16.mxu0 %v4198_v0  ;;  %v3771_v15 = vpop.f32.mrb[199].mxu1  ;;  %v1455_v57 = vpack.c.bf16 %v1430_v10, %v1430_v10  ;;  %v1435_v28 = vmax.f32 %v4678_v14, 0.0 }
 0x58d   :  { %v1431_v15 = vmax.f32 %v4661_v63, 0.0 }
 0x58f   :  { %3843 = vmatpush3.bf16.msra.mxu0 %v4130_v13  ;;  %v4152_v13 = vld [vmem:[#allocation2 + $0x138] sm:$0xff]   ;;  %v1456_v60 = vpack.c.bf16 %v1431_v15, %v1431_v15 }
 0x590   :  { %3848 = vmatprep.subr.bf16.mxu0 %v4198_v0 }
 0x591   :  { %v4683_v17 = vpop.f32.mrb[200].mxu1 }
 0x592   :  { %v3774_v18 = vpop.f32.mrb[201].mxu1 }
 0x593   :  { %v1409_v20 = vpop.f32.mrb[202].mxu1  ;;  %v4154_v18 = vld [vmem:[#allocation2 + $0x148] sm:$0xff]  }
 0x594   :  { %v3775_v22 = vpop.f32.mrb[203].mxu1  ;;  %v4155_v20 = vld [vmem:[#allocation2 + $0x150] sm:$0xff]  }
 0x595   :  { %v1433_v22 = vmax.f32 %v4669_v6, 0.0 }
 0x596   :  { %3845 = vmatmul.mubr.msk.bf16.vlgmr.msra.gmra.mrb[108].mxu0 %vm86_vm1, %v1445_v21  ;;  %v4156_v21 = vld [vmem:[#allocation2 + $0x158] sm:$0xff]  }
 0x597   :  { %3849 = vmatpush3.bf16.msra.mxu0 %v4131_v19  ;;  %3852 = vmatprep.mubr.msk.bf16.mxu0 %vm4199_vm0, %v4198_v0  ;;  %v1432_v19 = vmax.f32 %v4667_v4, 0.0  ;;  %v1458_v4 = vpack.c.bf16 %v1433_v22, %v1433_v22 }
 0x598   :  { %3850 = vmatprep.subr.bf16.mxu0 %v4198_v0 }
 0x599   :  { %v1457_v63 = vpack.c.bf16 %v1432_v19, %v1432_v19 }
 0x59b   :  { %3851 = vmatpush3.bf16.msra.mxu0 %v4132_v23  ;;  %v4157_v23 = vld [vmem:[#allocation2 + $0x160] sm:$0xff]  }
 0x59c   :  { %3856 = vmatprep.subr.bf16.mxu0 %v4198_v0 }
 0x5a2   :  { %3853 = vmatmul.mubr.msk.bf16.vlgmr.msra.gmra.mrb[108].mxu0 %vm86_vm1, %v1446_v26  ;;  %v4159_v26 = vld [vmem:[#allocation2 + $0x170] sm:$0xff]  }
 0x5a3   :  { %3857 = vmatpush3.bf16.msra.mxu0 %v4133_v25  ;;  %3860 = vmatprep.mubr.msk.bf16.mxu0 %vm4199_vm0, %v4198_v0  ;;  %v1434_v25 = vmax.f32 %v4673_v11, 0.0  ;;  %v1460_v11 = vpack.c.bf16 %v1435_v28, %v1435_v28 }
 0x5a4   :  { %3858 = vmatprep.subr.bf16.mxu0 %v4198_v0 }
 0x5a5   :  { %v1459_v6 = vpack.c.bf16 %v1434_v25, %v1434_v25 }
 0x5a7   :  { %3859 = vmatpush3.bf16.msra.mxu0 %v4134_v27  ;;  %v4160_v27 = vld [vmem:[#allocation2 + $0x178] sm:$0xff]  }
 0x5a8   :  { %3864 = vmatprep.subr.bf16.mxu0 %v4198_v0 }
 0x5ae   :  { %3861 = vmatmul.mubr.msk.bf16.vlgmr.msra.gmra.mrb[108].mxu0 %vm86_vm1, %v1447_v29  ;;  %v4162_v29 = vld [vmem:[#allocation2 + $0x188] sm:$0xff]  }
 0x5af   :  { %3865 = vmatpush3.bf16.msra.mxu0 %v4135_v30  ;;  %3868 = vmatprep.mubr.msk.bf16.mxu0 %vm4199_vm0, %v4198_v0  ;;  %v4161_v30 = vld [vmem:[#allocation2 + $0x180] sm:$0xff]  }
 0x5b0   :  { %3866 = vmatprep.subr.bf16.mxu0 %v4198_v0 }
 0x5b3   :  { %3867 = vmatpush3.bf16.msra.mxu0 %v4136_v31  ;;  %v1436_v31 = vmax.f32 %v4683_v17, 0.0 }
 0x5b4   :  { %3872 = vmatprep.subr.bf16.mxu0 %v4198_v0 }
 0x5b5   :  { %v1461_v32 = vpack.c.bf16 %v1436_v31, %v1436_v31 }
 0x5ba   :  { %3869 = vmatmul.mubr.msk.bf16.vlgmr.msra.gmra.mrb[108].mxu0 %vm86_vm1, %v1448_v34 }
 0x5bb   :  { %3873 = vmatpush3.bf16.msra.mxu0 %v4137_v33  ;;  %3876 = vmatprep.mubr.msk.bf16.mxu0 %vm4199_vm0, %v4198_v0 }
 0x5bc   :  { %3874 = vmatprep.subr.bf16.mxu0 %v4198_v0 }
 0x5bf   :  { %3875 = vmatpush3.bf16.msra.mxu0 %v4138_v35 }
 0x5c0   :  { %3880 = vmatprep.subr.bf16.mxu0 %v4198_v0 }
 0x5c6   :  { %3877 = vmatmul.mubr.msk.bf16.vlgmr.msra.gmra.mrb[108].mxu0 %vm86_vm1, %v1449_v37 }
 0x5c7   :  { %3881 = vmatpush3.bf16.msra.mxu0 %v4139_v38  ;;  %3884 = vmatprep.mubr.msk.bf16.mxu0 %vm4199_vm0, %v4198_v0 }
 0x5c8   :  { %3882 = vmatprep.subr.bf16.mxu0 %v4198_v0 }
 0x5cb   :  { %3883 = vmatpush3.bf16.msra.mxu0 %v4140_v39 }
 0x5cc   :  { %3888 = vmatprep.subr.bf16.mxu0 %v4198_v0 }
 0x5d2   :  { %3885 = vmatmul.mubr.msk.bf16.vlgmr.msra.gmra.mrb[108].mxu0 %vm86_vm1, %v1450_v40 }
 0x5d3   :  { %3889 = vmatpush3.bf16.msra.mxu0 %v4141_v42  ;;  %3892 = vmatprep.mubr.msk.bf16.mxu0 %vm4199_vm0, %v4198_v0 }
 0x5d4   :  { %3890 = vmatprep.subr.bf16.mxu0 %v4198_v0 }
 0x5d7   :  { %3891 = vmatpush3.bf16.msra.mxu0 %v4142_v44 }
 0x5d8   :  { %3896 = vmatprep.subr.bf16.mxu0 %v4198_v0 }
 0x5de   :  { %3893 = vmatmul.mubr.msk.bf16.vlgmr.msra.gmra.mrb[108].mxu0 %vm86_vm1, %v1451_v50 }
 0x5df   :  { %3897 = vmatpush3.bf16.msra.mxu0 %v4143_v48  ;;  %3900 = vmatprep.mubr.msk.bf16.mxu0 %vm4199_vm0, %v4198_v0 }
 0x5e0   :  { %3898 = vmatprep.subr.bf16.mxu0 %v4198_v0 }
 0x5e3   :  { %3899 = vmatpush3.bf16.msra.mxu0 %v4144_v47 }
 0x5e4   :  { %3904 = vmatprep.subr.bf16.mxu0 %v4198_v0 }
 0x5ea   :  { %3901 = vmatmul.mubr.msk.bf16.vlgmr.msra.gmra.mrb[108].mxu0 %vm86_vm1, %v1452_v58 }
 0x5eb   :  { %3905 = vmatpush3.bf16.msra.mxu0 %v4145_v56  ;;  %3908 = vmatprep.mubr.msk.bf16.mxu0 %vm4199_vm0, %v4198_v0 }
 0x5ec   :  { %3906 = vmatprep.subr.bf16.mxu0 %v4198_v0 }
 0x5ef   :  { %3907 = vmatpush3.bf16.msra.mxu0 %v4146_v49 }
 0x5f0   :  { %3912 = vmatprep.subr.bf16.mxu0 %v4198_v0 }
 0x5f6   :  { %3909 = vmatmul.mubr.msk.bf16.vlgmr.msra.gmra.mrb[108].mxu0 %vm86_vm1, %v1453_v3 }
 0x5f7   :  { %3913 = vmatpush3.bf16.msra.mxu0 %v4147_v2  ;;  %3916 = vmatprep.mubr.msk.bf16.mxu0 %vm4199_vm0, %v4198_v0 }
 0x5f8   :  { %3914 = vmatprep.subr.bf16.mxu0 %v4198_v0 }
 0x5fb   :  { %3915 = vmatpush3.bf16.msra.mxu0 %v4148_v5 }
 0x5fc   :  { %3920 = vmatprep.subr.bf16.mxu0 %v4198_v0 }
 0x602   :  { %3917 = vmatmul.mubr.msk.bf16.vlgmr.msra.gmra.mrb[108].mxu0 %vm86_vm1, %v1454_v8 }
 0x603   :  { %3921 = vmatpush3.bf16.msra.mxu0 %v4149_v7  ;;  %3924 = vmatprep.mubr.msk.bf16.mxu0 %vm4199_vm0, %v4198_v0 }
 0x604   :  { %3922 = vmatprep.subr.bf16.mxu0 %v4198_v0 }
 0x607   :  { %3923 = vmatpush3.bf16.msra.mxu0 %v4150_v9 }
 0x608   :  { %3928 = vmatprep.subr.bf16.mxu0 %v4198_v0 }
 0x60e   :  { %3925 = vmatmul.mubr.msk.bf16.vlgmr.msra.gmra.mrb[108].mxu0 %vm86_vm1, %v1455_v57 }
 0x60f   :  { %3929 = vmatpush3.bf16.msra.mxu0 %v4151_v12  ;;  %3932 = vmatprep.mubr.msk.bf16.mxu0 %vm4199_vm0, %v4198_v0 }
 0x610   :  { %3930 = vmatprep.subr.bf16.mxu0 %v4198_v0 }
 0x613   :  { %3931 = vmatpush3.bf16.msra.mxu0 %v4152_v13 }
 0x614   :  { %3936 = vmatprep.subr.bf16.mxu0 %v4198_v0 }
 0x61a   :  { %3933 = vmatmul.mubr.msk.bf16.vlgmr.msra.gmra.mrb[108].mxu0 %vm86_vm1, %v1456_v60 }
 0x61b   :  { %3937 = vmatpush3.bf16.msra.mxu0 %v4153_v16  ;;  %3940 = vmatprep.mubr.msk.bf16.mxu0 %vm4199_vm0, %v4198_v0 }
 0x61c   :  { %3938 = vmatprep.subr.bf16.mxu0 %v4198_v0 }
 0x61f   :  { %3939 = vmatpush3.bf16.msra.mxu0 %v4154_v18 }
 0x620   :  { %3944 = vmatprep.subr.bf16.mxu0 %v4198_v0 }
 0x626   :  { %3941 = vmatmul.mubr.msk.bf16.vlgmr.msra.gmra.mrb[108].mxu0 %vm86_vm1, %v1457_v63 }
 0x627   :  { %3945 = vmatpush3.bf16.msra.mxu0 %v4155_v20  ;;  %3948 = vmatprep.mubr.msk.bf16.mxu0 %vm4199_vm0, %v4198_v0 }
 0x628   :  { %3946 = vmatprep.subr.bf16.mxu0 %v4198_v0 }
 0x62b   :  { %3947 = vmatpush3.bf16.msra.mxu0 %v4156_v21 }
 0x62c   :  { %3952 = vmatprep.subr.bf16.mxu0 %v4198_v0 }
 0x632   :  { %3949 = vmatmul.mubr.msk.bf16.vlgmr.msra.gmra.mrb[108].mxu0 %vm86_vm1, %v1458_v4 }
 0x633   :  { %3953 = vmatpush3.bf16.msra.mxu0 %v4157_v23  ;;  %3956 = vmatprep.mubr.msk.bf16.mxu0 %vm4199_vm0, %v4198_v0 }
 0x634   :  { %3954 = vmatprep.subr.bf16.mxu0 %v4198_v0 }
 0x637   :  { %3955 = vmatpush3.bf16.msra.mxu0 %v4158_v24 }
 0x638   :  { %3960 = vmatprep.subr.bf16.mxu0 %v4198_v0 }
 0x63e   :  { %3957 = vmatmul.mubr.msk.bf16.vlgmr.msra.gmra.mrb[108].mxu0 %vm86_vm1, %v1459_v6 }
 0x63f   :  { %3961 = vmatpush3.bf16.msra.mxu0 %v4159_v26  ;;  %3964 = vmatprep.mubr.msk.bf16.mxu0 %vm4199_vm0, %v4198_v0 }
 0x640   :  { %3962 = vmatprep.subr.bf16.mxu0 %v4198_v0 }
 0x643   :  { %3963 = vmatpush3.bf16.msra.mxu0 %v4160_v27 }
 0x644   :  { %3968 = vmatprep.subr.bf16.mxu0 %v4198_v0 }
 0x64a   :  { %3965 = vmatmul.mubr.msk.bf16.vlgmr.msra.gmra.mrb[108].mxu0 %vm86_vm1, %v1460_v11 }
 0x64b   :  { %3969 = vmatpush3.bf16.msra.mxu0 %v4161_v30  ;;  %3972 = vmatprep.mubr.msk.bf16.mxu0 %vm4199_vm0, %v4198_v0 }
 0x64c   :  { %3970 = vmatprep.subr.bf16.mxu0 %v4198_v0 }
 0x64f   :  { %3971 = vmatpush3.bf16.msra.mxu0 %v4162_v29 }
 0x656   :  { %3973 = vmatmul.mubr.msk.bf16.vlgmr.msra.gmra.mrb[108].mxu0 %vm86_vm1, %v1461_v32 }
 0x729   :  { %v2931_v14 = vpop.f32.mrb[108].mxu0 }
 0x72a   :  { %v2961_v33 = vmax.f32 %v2931_v14, 0.0  ;;  %v3974_v34 = vpop.f32.mrb[109].mxu0 }
 0x72b   :  { %v2934_v35 = vpop.f32.mrb[110].mxu0 }
 0x72c   :  { %v2962_v36 = vpack.c.bf16 %v2961_v33, %v2961_v33  ;;  %v3975_v38 = vpop.f32.mrb[111].mxu0 }
 0x72e   :  { %3993 = vmatmul.mubr.bf16.vlgmr.msra.gmra.mrb[204].mxu1 %v2962_v36 }
 0x801   :  { %v3061_v37 = vpop.f32.mrb[204].mxu1 }
 0x802   :  { %3067 = vst [vmem:[%s4819_s4] sm:$0xff] %v3061_v37  ;;  %v3994_v39 = vpop.f32.mrb[205].mxu1 }
 0x803   :  { %v3064_v0 = vpop.f32.mrb[206].mxu1 }
 0x804   :  { %v3995_v41 = vpop.f32.mrb[207].mxu1 }
 0x805   :  { %3072 = vsyncpa [#allocation3], 1 }

</bundles_post_ra>
